<compile_context>
chip_gen: v5e
topology: v5e:2x2
jax: 0.10.0
libtpu: 0.0.40
codegen_flags: <defaults>
</compile_context>

<pallas_src>
import functools

import jax
import jax.numpy as jnp
from jax.experimental import pallas as pl
from jax.experimental.pallas import tpu as pltpu


# ---------------------------------------------------------------------------
# In-kernel helpers
# ---------------------------------------------------------------------------
def _lrelu(y):
    # LeakyReLU(0.2) as max(y, 0.2*y): one VALU op fewer than cmp+select.
    return jnp.maximum(y, 0.2 * y)


def _image_masks(m, n_img, positions):
    """Per-image lane masks (1, M); columns are ordered image-major (n, i, j)."""
    col = jax.lax.broadcasted_iota(jnp.int32, (1, m), 1)
    return [(col >= n * positions) & (col < (n + 1) * positions)
            for n in range(n_img)]


def _instnorm_lrelu(y, masks, inv_count):
    """InstanceNorm2d (eps=1e-5, no affine) + LeakyReLU(0.2).

    Per-image mean/var via masked lane reductions (no one-hot matmuls).
    y: (Cout, M) f32, M = n_img * positions, columns image-major.
    """
    mean_cols = jnp.zeros_like(y)
    for msk in masks:
        mean_n = jnp.sum(jnp.where(msk, y, 0.0), axis=-1, keepdims=True) * inv_count
        mean_cols = jnp.where(msk, mean_n, mean_cols)          # (C, M)
    cent = y - mean_cols
    sq = cent * cent
    var_cols = jnp.zeros_like(y)
    for msk in masks:
        var_n = jnp.sum(jnp.where(msk, sq, 0.0), axis=-1, keepdims=True) * inv_count
        var_cols = jnp.where(msk, var_n, var_cols)             # (C, M)
    return _lrelu(cent * jax.lax.rsqrt(var_cols + 1e-5))


# ---------------------------------------------------------------------------
# Pallas kernels (single grid step; full arrays resident in VMEM)
# ---------------------------------------------------------------------------
def _conv_kernel(w_ref, p_ref, b_ref, o_ref, *, apply_act):
    """Conv-as-matmul with lane-dense (Cout, M) output + bias [+ LeakyReLU]."""
    y = jnp.dot(w_ref[...], p_ref[...], preferred_element_type=jnp.float32)
    y = y + b_ref[...]
    o_ref[...] = _lrelu(y) if apply_act else y


def _conv_norm_kernel(w_ref, p_ref, b_ref, o_ref, *, n_img, positions):
    """Conv-as-matmul + bias + InstanceNorm + LeakyReLU, fully fused."""
    y = jnp.dot(w_ref[...], p_ref[...], preferred_element_type=jnp.float32)
    y = y + b_ref[...]
    masks = _image_masks(y.shape[1], n_img, positions)
    o_ref[...] = _instnorm_lrelu(y, masks, 1.0 / positions)


def _conv_norm_head_kernel(w_ref, p_ref, b_ref, wh_ref, bh_ref, o_ref, oh_ref, *,
                           n_img, positions):
    """Last middle layer (conv+bias+IN+LReLU) with the final conv (1x1-per-image
    output) fused in as elementwise multiply + masked per-image reduction."""
    y = jnp.dot(w_ref[...], p_ref[...], preferred_element_type=jnp.float32)
    y = y + b_ref[...]
    masks = _image_masks(y.shape[1], n_img, positions)
    y = _instnorm_lrelu(y, masks, 1.0 / positions)
    o_ref[...] = y
    # Final conv: score[n] = b + sum_{c,p} y[c, n*P + p] * w_head[c, p].
    # The score for image n is replicated across that image's lane columns;
    # the wrapper picks column 0 of each image block (tiny XLA slice).
    prod = y * wh_ref[...]
    scores = jnp.zeros((1, y.shape[1]), jnp.float32)
    for msk in masks:
        s = jnp.sum(jnp.where(msk, prod, 0.0), axis=-1, keepdims=True)   # (C, 1)
        s = jnp.sum(s, axis=0, keepdims=True)                            # (1, 1)
        scores = jnp.where(msk, s + bh_ref[...], scores)
    oh_ref[...] = scores


# ---------------------------------------------------------------------------
# pallas_call wrappers
# ---------------------------------------------------------------------------
def _vmem_spec(shape):
    nd = len(shape)
    return pl.BlockSpec(shape, lambda i, _nd=nd: (0,) * _nd)


_COMPILER_PARAMS = pltpu.CompilerParams(
    dimension_semantics=("arbitrary",),
    vmem_limit_bytes=32 * 1024 * 1024,   # explicit: v7x VMEM is only 64 MiB
)


def _cost(cout, kdim, m, norm):
    """Advisory cost estimate so XLA overlaps neighbouring fusions."""
    flops = 2 * cout * kdim * m + 4 * cout * m + (12 * cout * m if norm else 0)
    bytes_accessed = 2 * cout * kdim + 2 * kdim * m + 4 * cout + 4 * cout * m
    return pl.CostEstimate(flops=flops,
                           transcendentals=(cout * m if norm else 0),
                           bytes_accessed=bytes_accessed)


def run_conv(w_mat, pat_t, b_col, apply_act):
    cout, kdim = w_mat.shape
    m = pat_t.shape[1]
    return pl.pallas_call(
        functools.partial(_conv_kernel, apply_act=apply_act),
        out_shape=jax.ShapeDtypeStruct((cout, m), jnp.float32),
        grid=(1,),
        in_specs=[_vmem_spec((cout, kdim)), _vmem_spec((kdim, m)),
                  _vmem_spec((cout, 1))],
        out_specs=_vmem_spec((cout, m)),
        compiler_params=_COMPILER_PARAMS,
        cost_estimate=_cost(cout, kdim, m, norm=False),
    )(w_mat, pat_t, b_col)


def run_conv_norm(w_mat, pat_t, b_col, n_img, positions):
    cout, kdim = w_mat.shape
    m = pat_t.shape[1]
    return pl.pallas_call(
        functools.partial(_conv_norm_kernel, n_img=n_img, positions=positions),
        out_shape=jax.ShapeDtypeStruct((cout, m), jnp.float32),
        grid=(1,),
        in_specs=[_vmem_spec((cout, kdim)), _vmem_spec((kdim, m)),
                  _vmem_spec((cout, 1))],
        out_specs=_vmem_spec((cout, m)),
        compiler_params=_COMPILER_PARAMS,
        cost_estimate=_cost(cout, kdim, m, norm=True),
    )(w_mat, pat_t, b_col)


def run_conv_norm_head(w_mat, pat_t, b_col, w_head, b_head, n_img, positions):
    cout, kdim = w_mat.shape
    m = pat_t.shape[1]
    return pl.pallas_call(
        functools.partial(_conv_norm_head_kernel, n_img=n_img, positions=positions),
        out_shape=(jax.ShapeDtypeStruct((cout, m), jnp.float32),
                   jax.ShapeDtypeStruct((1, m), jnp.float32)),
        grid=(1,),
        in_specs=[_vmem_spec((cout, kdim)), _vmem_spec((kdim, m)),
                  _vmem_spec((cout, 1)), _vmem_spec((cout, m)),
                  _vmem_spec((1, 1))],
        out_specs=(_vmem_spec((cout, m)), _vmem_spec((1, m))),
        compiler_params=_COMPILER_PARAMS,
        cost_estimate=_cost(cout, kdim, m, norm=True),
    )(w_mat, pat_t, b_col, w_head, b_head)


# ---------------------------------------------------------------------------
# XLA glue: im2col (transposed), spectral norm, parameters
# ---------------------------------------------------------------------------
def im2col_t(act_cnhw, k, s):
    """(C, N, H, W) -> patchesT (k*k*C, N*Ho*Wo); rows ordered (di, dj, ci),
    columns ordered (n, i, j).  dtype-preserving (feed it bf16 directly)."""
    c, n, h, w = act_cnhw.shape
    ho = (h - k) // s + 1
    wo = (w - k) // s + 1
    cols = []
    for di in range(k):
        for dj in range(k):
            cols.append(act_cnhw[:, :, di:di + s * (ho - 1) + 1:s,
                                 dj:dj + s * (wo - 1) + 1:s])    # (C, N, Ho, Wo)
    pat = jnp.stack(cols, axis=0)                                 # (k*k, C, N, Ho, Wo)
    return pat.reshape(k * k * c, n * ho * wo), ho, wo


def spectral_normalize(w, key, n_iter=1, eps=1e-12):
    """nn.utils.spectral_norm semantics: W / sigma via power iteration."""
    cout = w.shape[0]
    w_mat = w.reshape(cout, -1)
    u = jax.random.normal(key, (cout,), jnp.float32)
    u = u / (jnp.linalg.norm(u) + eps)
    v = None
    for _ in range(n_iter):
        v = w_mat.T @ u
        v = v / (jnp.linalg.norm(v) + eps)
        u = w_mat @ v
        u = u / (jnp.linalg.norm(u) + eps)
    sigma = u @ (w_mat @ v)
    return w / sigma


def init_params(key, in_channels=3, num_layers=2, channels=8):
    params = []

    def add(key, cin, cout, stride, norm, act):
        key, wk, bk, uk = jax.random.split(key, 4)
        w = 0.1 * jax.random.normal(wk, (cout, cin, 4, 4), jnp.float32)
        w = spectral_normalize(w, uk)
        b = 0.01 * jax.random.normal(bk, (cout,), jnp.float32)
        # conv-as-matmul form: rows (di, dj, ci) match im2col_t's row order
        w_mat = jnp.transpose(w, (0, 2, 3, 1)).reshape(cout, 16 * cin)
        params.append(dict(w=w, b=b,
                           w_mat=w_mat.astype(jnp.bfloat16),
                           b_col=b.reshape(cout, 1).astype(jnp.float32),
                           k=4, stride=stride, norm=norm, act=act))
        return key

    key = add(key, in_channels, channels, 2, False, True)   # conv + lrelu
    ch = channels
    for _ in range(num_layers):
        key = add(key, ch, ch * 2, 2, True, True)            # conv + IN + lrelu
        ch *= 2
    add(key, ch, 1, 1, False, False)                         # final conv
    return params


def discriminator_forward(params, x_nchw):
    """Returns (final_output, list_of_intermediate_outputs), all NCHW."""
    n_img = x_nchw.shape[0]
    act = jnp.transpose(x_nchw, (1, 0, 2, 3)).astype(jnp.float32)   # (C, N, H, W)
    n_layers = len(params)
    outs = []
    idx = 0
    while idx < n_layers:
        p = params[idx]
        # bf16 cast happens on the (small) activation BEFORE im2col: the 16x
        # larger patch slab is built directly in bf16 (no arithmetic -> exact).
        pat_t, ho, wo = im2col_t(act.astype(jnp.bfloat16), p["k"], p["stride"])
        positions = ho * wo
        cout = p["w_mat"].shape[0]

        last = params[-1]
        # Head fusion is only valid for a stride-1, k==Ho==Wo, no-norm/no-act
        # final conv (the standard EDCNN Discriminator tail).  Any other
        # config falls back to a standalone run_conv call for the last layer.
        fuse_final = (p["norm"] and idx == n_layers - 2
                      and not last["norm"] and not last["act"]
                      and last["stride"] == 1
                      and last["k"] == ho and last["k"] == wo)

        if p["norm"]:
            if fuse_final:
                w_head = last["w"].reshape(cout, last["k"] * last["k"]).astype(jnp.float32)
                w_head = jnp.tile(w_head, (1, n_img))        # (Cout, M); constant-folded
                b_head = last["b"].reshape(1, 1).astype(jnp.float32)
                y, y_scores = run_conv_norm_head(p["w_mat"], pat_t, p["b_col"],
                                                 w_head, b_head, n_img, positions)
            else:
                y = run_conv_norm(p["w_mat"], pat_t, p["b_col"], n_img, positions)
        else:
            y = run_conv(p["w_mat"], pat_t, p["b_col"], apply_act=p["act"])

        act = y.reshape(cout, n_img, ho, wo)
        outs.append(jnp.transpose(act, (1, 0, 2, 3)))   # NCHW only for returned tensors
        idx += 1
        if fuse_final:
            final = y_scores.reshape(n_img, positions)[:, 0].reshape(n_img, 1, 1, 1)
            outs.append(final)
            idx += 1
    return outs[-1], outs[:-1]


# ---------------------------------------------------------------------------
# Pure-JAX f32 reference (for correctness checking)
# ---------------------------------------------------------------------------
def reference_forward(params, x):
    outs = []
    act = x
    for p in params:
        y = jax.lax.conv_general_dilated(
            act, p["w"], window_strides=(p["stride"], p["stride"]),
            padding="VALID", dimension_numbers=("NCHW", "OIHW", "NCHW"))
        y = y + p["b"].reshape(1, -1, 1, 1)
        if p["norm"]:
            mean = jnp.mean(y, axis=(2, 3), keepdims=True)
            var = jnp.mean((y - mean) ** 2, axis=(2, 3), keepdims=True)
            y = (y - mean) * jax.lax.rsqrt(var + 1e-5)
        if p["act"]:
            y = jnp.where(y >= 0, y, 0.2 * y)
        outs.append(y)
        act = y
    return outs[-1], outs[:-1]


if __name__ == "__main__":
    key = jax.random.PRNGKey(0)
    pkey, xkey = jax.random.split(key)

    in_channels, num_layers, channels = 3, 2, 8
    image_size = 48                       # 48 -> 23 -> 10 -> 4 -> 1
    params = init_params(pkey, in_channels, num_layers, channels)
    x = jax.random.normal(xkey, (2, in_channels, image_size, image_size),
                          jnp.float32)

    fwd = jax.jit(lambda inp: discriminator_forward(params, inp))
    final, feats = fwd(x)
    final = jax.block_until_ready(final)
    feats = [jax.block_until_ready(f) for f in feats]

    assert final.shape == (2, 1, 1, 1), final.shape
    assert feats[0].shape == (2, 8, 23, 23), feats[0].shape
    assert feats[1].shape == (2, 16, 10, 10), feats[1].shape
    assert feats[2].shape == (2, 32, 4, 4), feats[2].shape

    # numerical check vs. pure-JAX f32 reference (kernel deliberately feeds the
    # MXU bf16 inputs -> loose tolerance)
    ref_final, ref_feats = reference_forward(params, x)
    checks = [("final", final, ref_final)] + [
        ("feat%d" % i, f, r) for i, (f, r) in enumerate(zip(feats, ref_feats))]
    for name, got, ref in checks:
        err = float(jnp.max(jnp.abs(got - ref)))
        assert err < 2e-1, f"{name}: max abs err {err}"

    print("KERNEL_OK")
</pallas_src>

<mosaic_0001>
module attributes {stable_mosaic.version = 11 : i64} {
  func.func @_conv_kernel(%arg0: i32, %arg1: memref<8x48xbf16, #tpu.memory_space<vmem>>, %arg2: memref<48x1058xbf16, #tpu.memory_space<vmem>>, %arg3: memref<8x1xf32, #tpu.memory_space<vmem>>, %arg4: memref<8x1058xf32, #tpu.memory_space<vmem>>) attributes {dimension_semantics = [#tpu.dimension_semantics<arbitrary>], iteration_bounds = array<i64: 1>, scalar_prefetch = 0 : i64, scratch_operands = 0 : i64, tpu.core_type = #tpu.core_type<tc>, window_params = [{pipeline_mode = #tpu.pipeline_mode<synchronous>, transform_indices = @transform_0, window_bounds = array<i64: 8, 48>}, {pipeline_mode = #tpu.pipeline_mode<synchronous>, transform_indices = @transform_1, window_bounds = array<i64: 48, 1058>}, {pipeline_mode = #tpu.pipeline_mode<synchronous>, transform_indices = @transform_2, window_bounds = array<i64: 8, 1>}, {pipeline_mode = #tpu.pipeline_mode<synchronous>, transform_indices = @transform_3, window_bounds = array<i64: 8, 1058>}]} {
    %c0 = arith.constant 0 : index
    %c0_0 = arith.constant 0 : index
    %0 = vector.load %arg1[%c0, %c0_0] : memref<8x48xbf16, #tpu.memory_space<vmem>>, vector<8x48xbf16>
    %c0_1 = arith.constant 0 : index
    %c0_2 = arith.constant 0 : index
    %1 = vector.load %arg2[%c0_1, %c0_2] : memref<48x1058xbf16, #tpu.memory_space<vmem>>, vector<48x1058xbf16>
    %cst = arith.constant dense<0.000000e+00> : vector<8x1058xf32>
    %2 = tpu.matmul %0, %1, %cst {dimension_numbers = #tpu.dot_dimension_numbers<[1], [0], [0], [1], [0, 0, 1, 1], [], []>} : vector<8x48xbf16>, vector<48x1058xbf16>, vector<8x1058xf32> -> vector<8x1058xf32>
    %c0_3 = arith.constant 0 : index
    %c0_4 = arith.constant 0 : index
    %3 = vector.load %arg3[%c0_3, %c0_4] : memref<8x1xf32, #tpu.memory_space<vmem>>, vector<8x1xf32>
    %4 = vector.broadcast %3 : vector<8x1xf32> to vector<8x1058xf32>
    %5 = arith.addf %2, %4 : vector<8x1058xf32>
    %cst_5 = arith.constant 2.000000e-01 : f32
    %6 = vector.broadcast %cst_5 : f32 to vector<8x1058xf32>
    %7 = arith.mulf %6, %5 : vector<8x1058xf32>
    %8 = arith.maximumf %5, %7 : vector<8x1058xf32>
    %c0_6 = arith.constant 0 : index
    %c0_7 = arith.constant 0 : index
    %9 = vector.load %arg4[%c0_6, %c0_7] : memref<8x1058xf32, #tpu.memory_space<vmem>>, vector<8x1058xf32>
    tpu.vector_store %arg4[%c0_6, %c0_7], %8 {strides = array<i32>} : memref<8x1058xf32, #tpu.memory_space<vmem>>, vector<8x1058xf32>,
    return
  }
  func.func @transform_0(%arg0: i32) -> (i32, i32) {
    %c0_i32 = arith.constant 0 : i32
    %c0_i32_0 = arith.constant 0 : i32
    %c0_i32_1 = arith.constant 0 : i32
    return %c0_i32, %c0_i32_0 : i32, i32
  }
  func.func @transform_1(%arg0: i32) -> (i32, i32) {
    %c0_i32 = arith.constant 0 : i32
    %c0_i32_0 = arith.constant 0 : i32
    %c0_i32_1 = arith.constant 0 : i32
    return %c0_i32, %c0_i32_0 : i32, i32
  }
  func.func @transform_2(%arg0: i32) -> (i32, i32) {
    %c0_i32 = arith.constant 0 : i32
    %c0_i32_0 = arith.constant 0 : i32
    %c0_i32_1 = arith.constant 0 : i32
    return %c0_i32, %c0_i32_0 : i32, i32
  }
  func.func @transform_3(%arg0: i32) -> (i32, i32) {
    %c0_i32 = arith.constant 0 : i32
    %c0_i32_0 = arith.constant 0 : i32
    %c0_i32_1 = arith.constant 0 : i32
    return %c0_i32, %c0_i32_0 : i32, i32
  }
}

module attributes {stable_mosaic.version = 11 : i64} {
  func.func @_conv_norm_kernel(%arg0: i32, %arg1: memref<16x128xbf16, #tpu.memory_space<vmem>>, %arg2: memref<128x200xbf16, #tpu.memory_space<vmem>>, %arg3: memref<16x1xf32, #tpu.memory_space<vmem>>, %arg4: memref<16x200xf32, #tpu.memory_space<vmem>>) attributes {dimension_semantics = [#tpu.dimension_semantics<arbitrary>], iteration_bounds = array<i64: 1>, scalar_prefetch = 0 : i64, scratch_operands = 0 : i64, tpu.core_type = #tpu.core_type<tc>, window_params = [{pipeline_mode = #tpu.pipeline_mode<synchronous>, transform_indices = @transform_0, window_bounds = array<i64: 16, 128>}, {pipeline_mode = #tpu.pipeline_mode<synchronous>, transform_indices = @transform_1, window_bounds = array<i64: 128, 200>}, {pipeline_mode = #tpu.pipeline_mode<synchronous>, transform_indices = @transform_2, window_bounds = array<i64: 16, 1>}, {pipeline_mode = #tpu.pipeline_mode<synchronous>, transform_indices = @transform_3, window_bounds = array<i64: 16, 200>}]} {
    %c0 = arith.constant 0 : index
    %c0_0 = arith.constant 0 : index
    %0 = vector.load %arg1[%c0, %c0_0] : memref<16x128xbf16, #tpu.memory_space<vmem>>, vector<16x128xbf16>
    %c0_1 = arith.constant 0 : index
    %c0_2 = arith.constant 0 : index
    %1 = vector.load %arg2[%c0_1, %c0_2] : memref<128x200xbf16, #tpu.memory_space<vmem>>, vector<128x200xbf16>
    %cst = arith.constant dense<0.000000e+00> : vector<16x200xf32>
    %2 = tpu.matmul %0, %1, %cst {dimension_numbers = #tpu.dot_dimension_numbers<[1], [0], [0], [1], [0, 0, 1, 1], [], []>} : vector<16x128xbf16>, vector<128x200xbf16>, vector<16x200xf32> -> vector<16x200xf32>
    %c0_3 = arith.constant 0 : index
    %c0_4 = arith.constant 0 : index
    %3 = vector.load %arg3[%c0_3, %c0_4] : memref<16x1xf32, #tpu.memory_space<vmem>>, vector<16x1xf32>
    %4 = vector.broadcast %3 : vector<16x1xf32> to vector<16x200xf32>
    %5 = arith.addf %2, %4 : vector<16x200xf32>
    %6 = tpu.iota {dimensions = array<i32: 1>} : vector<1x200xi32>
    %c0_i32 = arith.constant 0 : i32
    %7 = vector.broadcast %c0_i32 : i32 to vector<1x200xi32>
    %8 = arith.cmpi sge, %6, %7 : vector<1x200xi32>
    %c100_i32 = arith.constant 100 : i32
    %9 = vector.broadcast %c100_i32 : i32 to vector<1x200xi32>
    %10 = arith.cmpi slt, %6, %9 : vector<1x200xi32>
    %11 = arith.andi %8, %10 : vector<1x200xi1>
    %c100_i32_5 = arith.constant 100 : i32
    %12 = vector.broadcast %c100_i32_5 : i32 to vector<1x200xi32>
    %13 = arith.cmpi sge, %6, %12 : vector<1x200xi32>
    %c200_i32 = arith.constant 200 : i32
    %14 = vector.broadcast %c200_i32 : i32 to vector<1x200xi32>
    %15 = arith.cmpi slt, %6, %14 : vector<1x200xi32>
    %16 = arith.andi %13, %15 : vector<1x200xi1>
    %cst_6 = arith.constant 0.000000e+00 : f32
    %17 = vector.broadcast %cst_6 : f32 to vector<16x200xf32>
    %cst_7 = arith.constant 0.000000e+00 : f32
    %18 = vector.shape_cast %11 : vector<1x200xi1> to vector<1x200xi1>
    %19 = vector.broadcast %18 : vector<1x200xi1> to vector<16x200xi1>
    %20 = vector.broadcast %cst_7 : f32 to vector<16x200xf32>
    %21 = arith.select %19, %5, %20 : vector<16x200xi1>, vector<16x200xf32>
    %cst_8 = arith.constant dense<0.000000e+00> : vector<16xf32>
    %22 = vector.multi_reduction <add>, %21, %cst_8 [1] : vector<16x200xf32> to vector<16xf32>
    %23 = vector.shape_cast %22 : vector<16xf32> to vector<16x1xf32>
    %cst_9 = arith.constant 0.00999999977 : f32
    %24 = vector.broadcast %cst_9 : f32 to vector<16x1xf32>
    %25 = arith.mulf %23, %24 : vector<16x1xf32>
    %26 = vector.shape_cast %11 : vector<1x200xi1> to vector<1x200xi1>
    %27 = vector.broadcast %26 : vector<1x200xi1> to vector<16x200xi1>
    %28 = vector.shape_cast %25 : vector<16x1xf32> to vector<16x1xf32>
    %29 = vector.broadcast %28 : vector<16x1xf32> to vector<16x200xf32>
    %30 = arith.select %27, %29, %17 : vector<16x200xi1>, vector<16x200xf32>
    %cst_10 = arith.constant 0.000000e+00 : f32
    %31 = vector.shape_cast %16 : vector<1x200xi1> to vector<1x200xi1>
    %32 = vector.broadcast %31 : vector<1x200xi1> to vector<16x200xi1>
    %33 = vector.broadcast %cst_10 : f32 to vector<16x200xf32>
    %34 = arith.select %32, %5, %33 : vector<16x200xi1>, vector<16x200xf32>
    %cst_11 = arith.constant dense<0.000000e+00> : vector<16xf32>
    %35 = vector.multi_reduction <add>, %34, %cst_11 [1] : vector<16x200xf32> to vector<16xf32>
    %36 = vector.shape_cast %35 : vector<16xf32> to vector<16x1xf32>
    %cst_12 = arith.constant 0.00999999977 : f32
    %37 = vector.broadcast %cst_12 : f32 to vector<16x1xf32>
    %38 = arith.mulf %36, %37 : vector<16x1xf32>
    %39 = vector.shape_cast %16 : vector<1x200xi1> to vector<1x200xi1>
    %40 = vector.broadcast %39 : vector<1x200xi1> to vector<16x200xi1>
    %41 = vector.shape_cast %38 : vector<16x1xf32> to vector<16x1xf32>
    %42 = vector.broadcast %41 : vector<16x1xf32> to vector<16x200xf32>
    %43 = arith.select %40, %42, %30 : vector<16x200xi1>, vector<16x200xf32>
    %44 = arith.subf %5, %43 : vector<16x200xf32>
    %45 = arith.mulf %44, %44 : vector<16x200xf32>
    %cst_13 = arith.constant 0.000000e+00 : f32
    %46 = vector.broadcast %cst_13 : f32 to vector<16x200xf32>
    %cst_14 = arith.constant 0.000000e+00 : f32
    %47 = vector.shape_cast %11 : vector<1x200xi1> to vector<1x200xi1>
    %48 = vector.broadcast %47 : vector<1x200xi1> to vector<16x200xi1>
    %49 = vector.broadcast %cst_14 : f32 to vector<16x200xf32>
    %50 = arith.select %48, %45, %49 : vector<16x200xi1>, vector<16x200xf32>
    %cst_15 = arith.constant dense<0.000000e+00> : vector<16xf32>
    %51 = vector.multi_reduction <add>, %50, %cst_15 [1] : vector<16x200xf32> to vector<16xf32>
    %52 = vector.shape_cast %51 : vector<16xf32> to vector<16x1xf32>
    %cst_16 = arith.constant 0.00999999977 : f32
    %53 = vector.broadcast %cst_16 : f32 to vector<16x1xf32>
    %54 = arith.mulf %52, %53 : vector<16x1xf32>
    %55 = vector.shape_cast %11 : vector<1x200xi1> to vector<1x200xi1>
    %56 = vector.broadcast %55 : vector<1x200xi1> to vector<16x200xi1>
    %57 = vector.shape_cast %54 : vector<16x1xf32> to vector<16x1xf32>
    %58 = vector.broadcast %57 : vector<16x1xf32> to vector<16x200xf32>
    %59 = arith.select %56, %58, %46 : vector<16x200xi1>, vector<16x200xf32>
    %cst_17 = arith.constant 0.000000e+00 : f32
    %60 = vector.shape_cast %16 : vector<1x200xi1> to vector<1x200xi1>
    %61 = vector.broadcast %60 : vector<1x200xi1> to vector<16x200xi1>
    %62 = vector.broadcast %cst_17 : f32 to vector<16x200xf32>
    %63 = arith.select %61, %45, %62 : vector<16x200xi1>, vector<16x200xf32>
    %cst_18 = arith.constant dense<0.000000e+00> : vector<16xf32>
    %64 = vector.multi_reduction <add>, %63, %cst_18 [1] : vector<16x200xf32> to vector<16xf32>
    %65 = vector.shape_cast %64 : vector<16xf32> to vector<16x1xf32>
    %cst_19 = arith.constant 0.00999999977 : f32
    %66 = vector.broadcast %cst_19 : f32 to vector<16x1xf32>
    %67 = arith.mulf %65, %66 : vector<16x1xf32>
    %68 = vector.shape_cast %16 : vector<1x200xi1> to vector<1x200xi1>
    %69 = vector.broadcast %68 : vector<1x200xi1> to vector<16x200xi1>
    %70 = vector.shape_cast %67 : vector<16x1xf32> to vector<16x1xf32>
    %71 = vector.broadcast %70 : vector<16x1xf32> to vector<16x200xf32>
    %72 = arith.select %69, %71, %59 : vector<16x200xi1>, vector<16x200xf32>
    %cst_20 = arith.constant 9.99999974E-6 : f32
    %73 = vector.broadcast %cst_20 : f32 to vector<16x200xf32>
    %74 = arith.addf %72, %73 : vector<16x200xf32>
    %75 = math.rsqrt %74 : vector<16x200xf32>
    %76 = arith.mulf %44, %75 : vector<16x200xf32>
    %cst_21 = arith.constant 2.000000e-01 : f32
    %77 = vector.broadcast %cst_21 : f32 to vector<16x200xf32>
    %78 = arith.mulf %77, %76 : vector<16x200xf32>
    %79 = arith.maximumf %76, %78 : vector<16x200xf32>
    %c0_22 = arith.constant 0 : index
    %c0_23 = arith.constant 0 : index
    %80 = vector.load %arg4[%c0_22, %c0_23] : memref<16x200xf32, #tpu.memory_space<vmem>>, vector<16x200xf32>
    tpu.vector_store %arg4[%c0_22, %c0_23], %79 {strides = array<i32>} : memref<16x200xf32, #tpu.memory_space<vmem>>, vector<16x200xf32>,
    return
  }
  func.func @transform_0(%arg0: i32) -> (i32, i32) {
    %c0_i32 = arith.constant 0 : i32
    %c0_i32_0 = arith.constant 0 : i32
    %c0_i32_1 = arith.constant 0 : i32
    return %c0_i32, %c0_i32_0 : i32, i32
  }
  func.func @transform_1(%arg0: i32) -> (i32, i32) {
    %c0_i32 = arith.constant 0 : i32
    %c0_i32_0 = arith.constant 0 : i32
    %c0_i32_1 = arith.constant 0 : i32
    return %c0_i32, %c0_i32_0 : i32, i32
  }
  func.func @transform_2(%arg0: i32) -> (i32, i32) {
    %c0_i32 = arith.constant 0 : i32
    %c0_i32_0 = arith.constant 0 : i32
    %c0_i32_1 = arith.constant 0 : i32
    return %c0_i32, %c0_i32_0 : i32, i32
  }
  func.func @transform_3(%arg0: i32) -> (i32, i32) {
    %c0_i32 = arith.constant 0 : i32
    %c0_i32_0 = arith.constant 0 : i32
    %c0_i32_1 = arith.constant 0 : i32
    return %c0_i32, %c0_i32_0 : i32, i32
  }
}

module attributes {stable_mosaic.version = 11 : i64} {
  func.func @_conv_norm_head_kernel(%arg0: i32, %arg1: memref<32x256xbf16, #tpu.memory_space<vmem>>, %arg2: memref<256x32xbf16, #tpu.memory_space<vmem>>, %arg3: memref<32x1xf32, #tpu.memory_space<vmem>>, %arg4: memref<32x32xf32, #tpu.memory_space<vmem>>, %arg5: memref<1x1xf32, #tpu.memory_space<vmem>>, %arg6: memref<32x32xf32, #tpu.memory_space<vmem>>, %arg7: memref<1x32xf32, #tpu.memory_space<vmem>>) attributes {dimension_semantics = [#tpu.dimension_semantics<arbitrary>], iteration_bounds = array<i64: 1>, scalar_prefetch = 0 : i64, scratch_operands = 0 : i64, tpu.core_type = #tpu.core_type<tc>, window_params = [{pipeline_mode = #tpu.pipeline_mode<synchronous>, transform_indices = @transform_0, window_bounds = array<i64: 32, 256>}, {pipeline_mode = #tpu.pipeline_mode<synchronous>, transform_indices = @transform_1, window_bounds = array<i64: 256, 32>}, {pipeline_mode = #tpu.pipeline_mode<synchronous>, transform_indices = @transform_2, window_bounds = array<i64: 32, 1>}, {pipeline_mode = #tpu.pipeline_mode<synchronous>, transform_indices = @transform_3, window_bounds = array<i64: 32, 32>}, {pipeline_mode = #tpu.pipeline_mode<synchronous>, transform_indices = @transform_4, window_bounds = array<i64: 1, 1>}, {pipeline_mode = #tpu.pipeline_mode<synchronous>, transform_indices = @transform_5, window_bounds = array<i64: 32, 32>}, {pipeline_mode = #tpu.pipeline_mode<synchronous>, transform_indices = @transform_6, window_bounds = array<i64: 1, 32>}]} {
    %c0 = arith.constant 0 : index
    %c0_0 = arith.constant 0 : index
    %0 = vector.load %arg1[%c0, %c0_0] : memref<32x256xbf16, #tpu.memory_space<vmem>>, vector<32x256xbf16>
    %c0_1 = arith.constant 0 : index
    %c0_2 = arith.constant 0 : index
    %1 = vector.load %arg2[%c0_1, %c0_2] : memref<256x32xbf16, #tpu.memory_space<vmem>>, vector<256x32xbf16>
    %cst = arith.constant dense<0.000000e+00> : vector<32x32xf32>
    %2 = tpu.matmul %0, %1, %cst {dimension_numbers = #tpu.dot_dimension_numbers<[1], [0], [0], [1], [0, 0, 1, 1], [], []>} : vector<32x256xbf16>, vector<256x32xbf16>, vector<32x32xf32> -> vector<32x32xf32>
    %c0_3 = arith.constant 0 : index
    %c0_4 = arith.constant 0 : index
    %3 = vector.load %arg3[%c0_3, %c0_4] : memref<32x1xf32, #tpu.memory_space<vmem>>, vector<32x1xf32>
    %4 = vector.broadcast %3 : vector<32x1xf32> to vector<32x32xf32>
    %5 = arith.addf %2, %4 : vector<32x32xf32>
    %6 = tpu.iota {dimensions = array<i32: 1>} : vector<1x32xi32>
    %c0_i32 = arith.constant 0 : i32
    %7 = vector.broadcast %c0_i32 : i32 to vector<1x32xi32>
    %8 = arith.cmpi sge, %6, %7 : vector<1x32xi32>
    %c16_i32 = arith.constant 16 : i32
    %9 = vector.broadcast %c16_i32 : i32 to vector<1x32xi32>
    %10 = arith.cmpi slt, %6, %9 : vector<1x32xi32>
    %11 = arith.andi %8, %10 : vector<1x32xi1>
    %c16_i32_5 = arith.constant 16 : i32
    %12 = vector.broadcast %c16_i32_5 : i32 to vector<1x32xi32>
    %13 = arith.cmpi sge, %6, %12 : vector<1x32xi32>
    %c32_i32 = arith.constant 32 : i32
    %14 = vector.broadcast %c32_i32 : i32 to vector<1x32xi32>
    %15 = arith.cmpi slt, %6, %14 : vector<1x32xi32>
    %16 = arith.andi %13, %15 : vector<1x32xi1>
    %cst_6 = arith.constant 0.000000e+00 : f32
    %17 = vector.broadcast %cst_6 : f32 to vector<32x32xf32>
    %cst_7 = arith.constant 0.000000e+00 : f32
    %18 = vector.shape_cast %11 : vector<1x32xi1> to vector<1x32xi1>
    %19 = vector.broadcast %18 : vector<1x32xi1> to vector<32x32xi1>
    %20 = vector.broadcast %cst_7 : f32 to vector<32x32xf32>
    %21 = arith.select %19, %5, %20 : vector<32x32xi1>, vector<32x32xf32>
    %cst_8 = arith.constant dense<0.000000e+00> : vector<32xf32>
    %22 = vector.multi_reduction <add>, %21, %cst_8 [1] : vector<32x32xf32> to vector<32xf32>
    %23 = vector.shape_cast %22 : vector<32xf32> to vector<32x1xf32>
    %cst_9 = arith.constant 6.250000e-02 : f32
    %24 = vector.broadcast %cst_9 : f32 to vector<32x1xf32>
    %25 = arith.mulf %23, %24 : vector<32x1xf32>
    %26 = vector.shape_cast %11 : vector<1x32xi1> to vector<1x32xi1>
    %27 = vector.broadcast %26 : vector<1x32xi1> to vector<32x32xi1>
    %28 = vector.shape_cast %25 : vector<32x1xf32> to vector<32x1xf32>
    %29 = vector.broadcast %28 : vector<32x1xf32> to vector<32x32xf32>
    %30 = arith.select %27, %29, %17 : vector<32x32xi1>, vector<32x32xf32>
    %cst_10 = arith.constant 0.000000e+00 : f32
    %31 = vector.shape_cast %16 : vector<1x32xi1> to vector<1x32xi1>
    %32 = vector.broadcast %31 : vector<1x32xi1> to vector<32x32xi1>
    %33 = vector.broadcast %cst_10 : f32 to vector<32x32xf32>
    %34 = arith.select %32, %5, %33 : vector<32x32xi1>, vector<32x32xf32>
    %cst_11 = arith.constant dense<0.000000e+00> : vector<32xf32>
    %35 = vector.multi_reduction <add>, %34, %cst_11 [1] : vector<32x32xf32> to vector<32xf32>
    %36 = vector.shape_cast %35 : vector<32xf32> to vector<32x1xf32>
    %cst_12 = arith.constant 6.250000e-02 : f32
    %37 = vector.broadcast %cst_12 : f32 to vector<32x1xf32>
    %38 = arith.mulf %36, %37 : vector<32x1xf32>
    %39 = vector.shape_cast %16 : vector<1x32xi1> to vector<1x32xi1>
    %40 = vector.broadcast %39 : vector<1x32xi1> to vector<32x32xi1>
    %41 = vector.shape_cast %38 : vector<32x1xf32> to vector<32x1xf32>
    %42 = vector.broadcast %41 : vector<32x1xf32> to vector<32x32xf32>
    %43 = arith.select %40, %42, %30 : vector<32x32xi1>, vector<32x32xf32>
    %44 = arith.subf %5, %43 : vector<32x32xf32>
    %45 = arith.mulf %44, %44 : vector<32x32xf32>
    %cst_13 = arith.constant 0.000000e+00 : f32
    %46 = vector.broadcast %cst_13 : f32 to vector<32x32xf32>
    %cst_14 = arith.constant 0.000000e+00 : f32
    %47 = vector.shape_cast %11 : vector<1x32xi1> to vector<1x32xi1>
    %48 = vector.broadcast %47 : vector<1x32xi1> to vector<32x32xi1>
    %49 = vector.broadcast %cst_14 : f32 to vector<32x32xf32>
    %50 = arith.select %48, %45, %49 : vector<32x32xi1>, vector<32x32xf32>
    %cst_15 = arith.constant dense<0.000000e+00> : vector<32xf32>
    %51 = vector.multi_reduction <add>, %50, %cst_15 [1] : vector<32x32xf32> to vector<32xf32>
    %52 = vector.shape_cast %51 : vector<32xf32> to vector<32x1xf32>
    %cst_16 = arith.constant 6.250000e-02 : f32
    %53 = vector.broadcast %cst_16 : f32 to vector<32x1xf32>
    %54 = arith.mulf %52, %53 : vector<32x1xf32>
    %55 = vector.shape_cast %11 : vector<1x32xi1> to vector<1x32xi1>
    %56 = vector.broadcast %55 : vector<1x32xi1> to vector<32x32xi1>
    %57 = vector.shape_cast %54 : vector<32x1xf32> to vector<32x1xf32>
    %58 = vector.broadcast %57 : vector<32x1xf32> to vector<32x32xf32>
    %59 = arith.select %56, %58, %46 : vector<32x32xi1>, vector<32x32xf32>
    %cst_17 = arith.constant 0.000000e+00 : f32
    %60 = vector.shape_cast %16 : vector<1x32xi1> to vector<1x32xi1>
    %61 = vector.broadcast %60 : vector<1x32xi1> to vector<32x32xi1>
    %62 = vector.broadcast %cst_17 : f32 to vector<32x32xf32>
    %63 = arith.select %61, %45, %62 : vector<32x32xi1>, vector<32x32xf32>
    %cst_18 = arith.constant dense<0.000000e+00> : vector<32xf32>
    %64 = vector.multi_reduction <add>, %63, %cst_18 [1] : vector<32x32xf32> to vector<32xf32>
    %65 = vector.shape_cast %64 : vector<32xf32> to vector<32x1xf32>
    %cst_19 = arith.constant 6.250000e-02 : f32
    %66 = vector.broadcast %cst_19 : f32 to vector<32x1xf32>
    %67 = arith.mulf %65, %66 : vector<32x1xf32>
    %68 = vector.shape_cast %16 : vector<1x32xi1> to vector<1x32xi1>
    %69 = vector.broadcast %68 : vector<1x32xi1> to vector<32x32xi1>
    %70 = vector.shape_cast %67 : vector<32x1xf32> to vector<32x1xf32>
    %71 = vector.broadcast %70 : vector<32x1xf32> to vector<32x32xf32>
    %72 = arith.select %69, %71, %59 : vector<32x32xi1>, vector<32x32xf32>
    %cst_20 = arith.constant 9.99999974E-6 : f32
    %73 = vector.broadcast %cst_20 : f32 to vector<32x32xf32>
    %74 = arith.addf %72, %73 : vector<32x32xf32>
    %75 = math.rsqrt %74 : vector<32x32xf32>
    %76 = arith.mulf %44, %75 : vector<32x32xf32>
    %cst_21 = arith.constant 2.000000e-01 : f32
    %77 = vector.broadcast %cst_21 : f32 to vector<32x32xf32>
    %78 = arith.mulf %77, %76 : vector<32x32xf32>
    %79 = arith.maximumf %76, %78 : vector<32x32xf32>
    %c0_22 = arith.constant 0 : index
    %c0_23 = arith.constant 0 : index
    %80 = vector.load %arg6[%c0_22, %c0_23] : memref<32x32xf32, #tpu.memory_space<vmem>>, vector<32x32xf32>
    tpu.vector_store %arg6[%c0_22, %c0_23], %79 {strides = array<i32>} : memref<32x32xf32, #tpu.memory_space<vmem>>, vector<32x32xf32>,
    %c0_24 = arith.constant 0 : index
    %c0_25 = arith.constant 0 : index
    %81 = vector.load %arg4[%c0_24, %c0_25] : memref<32x32xf32, #tpu.memory_space<vmem>>, vector<32x32xf32>
    %82 = arith.mulf %79, %81 : vector<32x32xf32>
    %cst_26 = arith.constant 0.000000e+00 : f32
    %83 = vector.broadcast %cst_26 : f32 to vector<1x32xf32>
    %cst_27 = arith.constant 0.000000e+00 : f32
    %84 = vector.shape_cast %11 : vector<1x32xi1> to vector<1x32xi1>
    %85 = vector.broadcast %84 : vector<1x32xi1> to vector<32x32xi1>
    %86 = vector.broadcast %cst_27 : f32 to vector<32x32xf32>
    %87 = arith.select %85, %82, %86 : vector<32x32xi1>, vector<32x32xf32>
    %cst_28 = arith.constant dense<0.000000e+00> : vector<32xf32>
    %88 = vector.multi_reduction <add>, %87, %cst_28 [1] : vector<32x32xf32> to vector<32xf32>
    %89 = vector.shape_cast %88 : vector<32xf32> to vector<32x1xf32>
    %cst_29 = arith.constant dense<0.000000e+00> : vector<1xf32>
    %90 = vector.multi_reduction <add>, %89, %cst_29 [0] : vector<32x1xf32> to vector<1xf32>
    %91 = vector.shape_cast %90 : vector<1xf32> to vector<1x1xf32>
    %c0_30 = arith.constant 0 : index
    %c0_31 = arith.constant 0 : index
    %92 = vector.load %arg5[%c0_30, %c0_31] : memref<1x1xf32, #tpu.memory_space<vmem>>, vector<1x1xf32>
    %93 = arith.addf %91, %92 : vector<1x1xf32>
    %94 = vector.shape_cast %93 : vector<1x1xf32> to vector<1x1xf32>
    %95 = vector.broadcast %94 : vector<1x1xf32> to vector<1x32xf32>
    %96 = arith.select %11, %95, %83 : vector<1x32xi1>, vector<1x32xf32>
    %cst_32 = arith.constant 0.000000e+00 : f32
    %97 = vector.shape_cast %16 : vector<1x32xi1> to vector<1x32xi1>
    %98 = vector.broadcast %97 : vector<1x32xi1> to vector<32x32xi1>
    %99 = vector.broadcast %cst_32 : f32 to vector<32x32xf32>
    %100 = arith.select %98, %82, %99 : vector<32x32xi1>, vector<32x32xf32>
    %cst_33 = arith.constant dense<0.000000e+00> : vector<32xf32>
    %101 = vector.multi_reduction <add>, %100, %cst_33 [1] : vector<32x32xf32> to vector<32xf32>
    %102 = vector.shape_cast %101 : vector<32xf32> to vector<32x1xf32>
    %cst_34 = arith.constant dense<0.000000e+00> : vector<1xf32>
    %103 = vector.multi_reduction <add>, %102, %cst_34 [0] : vector<32x1xf32> to vector<1xf32>
    %104 = vector.shape_cast %103 : vector<1xf32> to vector<1x1xf32>
    %c0_35 = arith.constant 0 : index
    %c0_36 = arith.constant 0 : index
    %105 = vector.load %arg5[%c0_35, %c0_36] : memref<1x1xf32, #tpu.memory_space<vmem>>, vector<1x1xf32>
    %106 = arith.addf %104, %105 : vector<1x1xf32>
    %107 = vector.shape_cast %106 : vector<1x1xf32> to vector<1x1xf32>
    %108 = vector.broadcast %107 : vector<1x1xf32> to vector<1x32xf32>
    %109 = arith.select %16, %108, %96 : vector<1x32xi1>, vector<1x32xf32>
    %c0_37 = arith.constant 0 : index
    %c0_38 = arith.constant 0 : index
    %110 = vector.load %arg7[%c0_37, %c0_38] : memref<1x32xf32, #tpu.memory_space<vmem>>, vector<1x32xf32>
    tpu.vector_store %arg7[%c0_37, %c0_38], %109 {strides = array<i32>} : memref<1x32xf32, #tpu.memory_space<vmem>>, vector<1x32xf32>,
    return
  }
  func.func @transform_0(%arg0: i32) -> (i32, i32) {
    %c0_i32 = arith.constant 0 : i32
    %c0_i32_0 = arith.constant 0 : i32
    %c0_i32_1 = arith.constant 0 : i32
    return %c0_i32, %c0_i32_0 : i32, i32
  }
  func.func @transform_1(%arg0: i32) -> (i32, i32) {
    %c0_i32 = arith.constant 0 : i32
    %c0_i32_0 = arith.constant 0 : i32
    %c0_i32_1 = arith.constant 0 : i32
    return %c0_i32, %c0_i32_0 : i32, i32
  }
  func.func @transform_2(%arg0: i32) -> (i32, i32) {
    %c0_i32 = arith.constant 0 : i32
    %c0_i32_0 = arith.constant 0 : i32
    %c0_i32_1 = arith.constant 0 : i32
    return %c0_i32, %c0_i32_0 : i32, i32
  }
  func.func @transform_3(%arg0: i32) -> (i32, i32) {
    %c0_i32 = arith.constant 0 : i32
    %c0_i32_0 = arith.constant 0 : i32
    %c0_i32_1 = arith.constant 0 : i32
    return %c0_i32, %c0_i32_0 : i32, i32
  }
  func.func @transform_4(%arg0: i32) -> (i32, i32) {
    %c0_i32 = arith.constant 0 : i32
    %c0_i32_0 = arith.constant 0 : i32
    %c0_i32_1 = arith.constant 0 : i32
    return %c0_i32, %c0_i32_0 : i32, i32
  }
  func.func @transform_5(%arg0: i32) -> (i32, i32) {
    %c0_i32 = arith.constant 0 : i32
    %c0_i32_0 = arith.constant 0 : i32
    %c0_i32_1 = arith.constant 0 : i32
    return %c0_i32, %c0_i32_0 : i32, i32
  }
  func.func @transform_6(%arg0: i32) -> (i32, i32) {
    %c0_i32 = arith.constant 0 : i32
    %c0_i32_0 = arith.constant 0 : i32
    %c0_i32_1 = arith.constant 0 : i32
    return %c0_i32, %c0_i32_0 : i32, i32
  }
}

</mosaic_0001>

<bundles_post_ra>
// kernel: _lambda_.3
= control target key start
LH: loop header
LB: loop body
LE: loop exit
PB: predicated region body
PF: predicated region fallthrough
CT: control target
= control target key end

     0   :  { %v489_v3 = vmov 0   ;;  %vm190_vm0 = vcmask 392192   ;;  %vm337_vm1 = vcmask 277504   ;;  %s725_s1 = inlined_call_operand.vmem [shape: bf16[48,1058], index: 1, kind: input, shape index: {}]   ;;  %s726_s0 = inlined_call_operand.vmem [shape: bf16[8,48], index: 0, kind: input, shape index: {}]   ;;  %s727_s2 = inlined_call_operand.vmem [shape: f32[8,1], index: 2, kind: input, shape index: {}]   ;;  %s728_s3 = inlined_call_operand.vmem [shape: f32[8,1058], index: 3, kind: output, shape index: {}]  }
   0x1   :  { %v417_v0 = vld [vmem:[%s725_s1 + $0x90] sm:$0xf]  ;;  %v482_v1 = vld [vmem:[%s725_s1 + $0xb0] sm:$0xf0]  ;;  %v425_v2 = vld [vmem:[%s725_s1 + $0x98] sm:$0xf]  ;;  %488 = vset.pattern.permute.xlu0 %v489_v3 }
   0x2   :  { %v418_v4 = vor.u32 %v482_v1, %v417_v0  ;;  %v483_v5 = vld [vmem:[%s725_s1 + $0xb8] sm:$0xf0]  ;;  %v427_v7 = vld [vmem:[%s725_s1 + $0xbc] sm:$0xf0]  ;;  %v381_v10 = vld [vmem:[%s725_s1 + $0x48] sm:$0xf] }
   0x3   :  { %v479_v6 = vld [vmem:[%s725_s1 + $0x9c] sm:$0xf]  ;;  %v426_v8 = vor.u32 %v483_v5, %v425_v2  ;;  %v473_v11 = vld [vmem:[%s725_s1 + $0x68] sm:$0xf0]  ;;  %v389_v12 = vld [vmem:[%s725_s1 + $0x50] sm:$0xf] }
   0x4   :  { %v430_v9 = vor.u32 %v479_v6, %v427_v7  ;;  %199 = vmatpush.bf16.msra.mxu0 %v418_v4  ;;  %v382_v13 = vor.u32 %v473_v11, %v381_v10  ;;  %v474_v14 = vld [vmem:[%s725_s1 + $0x70] sm:$0xf0]  ;;  %v391_v16 = vld [vmem:[%s725_s1 + $0x74] sm:$0xf0]  ;;  %v345_v19 = vld [vmem:[%s725_s1] sm:$0xf] }
   0x5   :  { %v470_v15 = vld [vmem:[%s725_s1 + $0x54] sm:$0xf]  ;;  %225 = vmatpush.bf16.msra.mxu2 %v426_v8  ;;  %v390_v17 = vor.u32 %v474_v14, %v389_v12  ;;  %v464_v20 = vld [vmem:[%s725_s1 + $0x20] sm:$0xf0]  ;;  %v419_v22 = vld [vmem:[%s725_s1 + $0xb4] sm:$0xf0] }
   0x6   :  { %238 = vmatpush.bf16.msra.mxu3 %v430_v9  ;;  %v394_v18 = vor.u32 %v470_v15, %v391_v16  ;;  %v478_v21 = vld [vmem:[%s725_s1 + $0x94] sm:$0xf]  ;;  %v353_v23 = vld [vmem:[%s725_s1 + $0x8] sm:$0xf]  ;;  %v465_v24 = vld [vmem:[%s725_s1 + $0x28] sm:$0xf0]  ;;  %v346_v28 = vor.u32 %v464_v20, %v345_v19 }
   0x7   :  { %v422_v25 = vor.u32 %v478_v21, %v419_v22  ;;  %v461_v26 = vld [vmem:[%s725_s1 + $0xc] sm:$0xf]  ;;  %v355_v27 = vld [vmem:[%s725_s1 + $0x2c] sm:$0xf0]  ;;  %v433_v29 = vld [vmem:[%s725_s1 + $0xa0] sm:$0xf]  ;;  %v354_v32 = vor.u32 %v465_v24, %v353_v23 }
   0x8   :  { %200 = vmatpush.bf16.msra.mxu0 %v382_v13  ;;  %v484_v30 = vld [vmem:[%s725_s1 + $0xc0] sm:$0xf0]  ;;  %v469_v31 = vld [vmem:[%s725_s1 + $0x4c] sm:$0xf]  ;;  %v358_v33 = vor.u32 %v461_v26, %v355_v27  ;;  %v383_v34 = vld [vmem:[%s725_s1 + $0x6c] sm:$0xf0] }
   0x9   :  { %226 = vmatpush.bf16.msra.mxu2 %v390_v17  ;;  %v460_v35 = vld [vmem:[%s725_s1 + $0x4] sm:$0xf]  ;;  %v347_v36 = vld [vmem:[%s725_s1 + $0x24] sm:$0xf0]  ;;  %212 = vmatpush.bf16.msra.mxu1 %v422_v25  ;;  %v434_v37 = vor.u32 %v484_v30, %v433_v29  ;;  %v386_v38 = vor.u32 %v469_v31, %v383_v34  ;;  %v397_v39 = vld [vmem:[%s725_s1 + $0x58] sm:$0xf] }
   0xa   :  { %239 = vmatpush.bf16.msra.mxu3 %v394_v18  ;;  %v475_v40 = vld [vmem:[%s725_s1 + $0x78] sm:$0xf0]  ;;  %v441_v41 = vld [vmem:[%s725_s1 + $0xa8] sm:$0xf]  ;;  %v485_v42 = vld [vmem:[%s725_s1 + $0xc8] sm:$0xf0]  ;;  %v350_v52 = vor.u32 %v460_v35, %v347_v36 }
   0xb   :  { %v481_v43 = vld [vmem:[%s725_s1 + $0xac] sm:$0xf]  ;;  %v443_v44 = vld [vmem:[%s725_s1 + $0xcc] sm:$0xf0]  ;;  %v609_v45 = vld [vmem:[%s726_s0] sm:$0xf]  ;;  %v442_v46 = vor.u32 %v485_v42, %v441_v41  ;;  %v398_v53 = vor.u32 %v475_v40, %v397_v39 }
   0xc   :  { %201 = vmatpush.bf16.msra.mxu0 %v346_v28  ;;  %v46_v47 = vld [vmem:[%s727_s2] sm:$0xff]  ;;  %v446_v48 = vor.u32 %v481_v43, %v443_v44  ;;  %v407_v54 = vld [vmem:[%s725_s1 + $0x84] sm:$0xf0]  ;;  %v361_v57 = vld [vmem:[%s725_s1 + $0x10] sm:$0xf] }
   0xd   :  { %227 = vmatpush.bf16.msra.mxu2 %v354_v32  ;;  %v405_v49 = vld [vmem:[%s725_s1 + $0x60] sm:$0xf]  ;;  %v476_v50 = vld [vmem:[%s725_s1 + $0x80] sm:$0xf0]  ;;  %213 = vmatpush.bf16.msra.mxu1 %v386_v38  ;;  %v435_v56 = vld [vmem:[%s725_s1 + $0xc4] sm:$0xf0] }
   0xe   :  { %240 = vmatpush.bf16.msra.mxu3 %v358_v33  ;;  %v472_v51 = vld [vmem:[%s725_s1 + $0x64] sm:$0xf]  ;;  %v466_v58 = vld [vmem:[%s725_s1 + $0x30] sm:$0xf0]  ;;  %v406_v59 = vor.u32 %v476_v50, %v405_v49  ;;  %v369_v61 = vld [vmem:[%s725_s1 + $0x18] sm:$0xf]  ;;  %49 = vperm.xlu0 %488, %v46_v47  }
   0xf   :  { %v480_v55 = vld [vmem:[%s725_s1 + $0xa4] sm:$0xf]  ;;  %451 = vmatmul.msk.bf16.vlgmr.msra.gmra.mxu0 %vm190_vm0, %v609_v45  ;;  %v467_v62 = vld [vmem:[%s725_s1 + $0x38] sm:$0xf0]  ;;  %v449_v63 = vld [vmem:[%s725_s1 + $0xb0] sm:$0xf]  ;;  %v410_v1 = vor.u32 %v472_v51, %v407_v54  ;;  %v362_v4 = vor.u32 %v466_v58, %v361_v57 }
  0x10   :  { %251 = vmatpush.bf16.msrb.mxu0 %v434_v37  ;;  %v438_v60 = vor.u32 %v480_v55, %v435_v56  ;;  %453 = vmatmul.msk.bf16.vlgmr.msra.gmra.mxu2 %vm190_vm0, %v609_v45  ;;  %v486_v0 = vld [vmem:[%s725_s1 + $0xd0] sm:$0xf0]  ;;  %v471_v2 = vld [vmem:[%s725_s1 + $0x5c] sm:$0xf]  ;;  %v399_v3 = vld [vmem:[%s725_s1 + $0x7c] sm:$0xf0]  ;;  %v370_v7 = vor.u32 %v467_v62, %v369_v61 }
  0x11   :  { %277 = vmatpush.bf16.msrb.mxu2 %v442_v46  ;;  %454 = vmatmul.msk.bf16.vlgmr.msra.gmra.mxu3 %vm190_vm0, %v609_v45  ;;  %v463_v5 = vld [vmem:[%s725_s1 + $0x1c] sm:$0xf]  ;;  %v371_v6 = vld [vmem:[%s725_s1 + $0x3c] sm:$0xf0]  ;;  %v450_v8 = vor.u32 %v486_v0, %v449_v63  ;;  %v402_v9 = vor.u32 %v471_v2, %v399_v3  ;;  %v413_v10 = vld [vmem:[%s725_s1 + $0x68] sm:$0xf] }
  0x12   :  { %290 = vmatpush.bf16.msrb.mxu3 %v446_v48  ;;  %214 = vmatpush.bf16.msra.mxu1 %v350_v52  ;;  %v477_v11 = vld [vmem:[%s725_s1 + $0x88] sm:$0xf0]  ;;  %v374_v12 = vor.u32 %v463_v5, %v371_v6  ;;  %v462_v13 = vld [vmem:[%s725_s1 + $0x14] sm:$0xf]  ;;  %v363_v14 = vld [vmem:[%s725_s1 + $0x34] sm:$0xf0] }
  0x13   :  { %v414_v15 = vor.u32 %v477_v11, %v413_v10  ;;  %v366_v16 = vor.u32 %v462_v13, %v363_v14  ;;  %v377_v17 = vld [vmem:[%s725_s1 + $0x20] sm:$0xf]  ;;  %v468_v18 = vld [vmem:[%s725_s1 + $0x40] sm:$0xf0] }
  0x14   :  { %252 = vmatpush.bf16.msrb.mxu0 %v398_v53  ;;  %v378_v19 = vor.u32 %v468_v18, %v377_v17 }
  0x15   :  { %278 = vmatpush.bf16.msrb.mxu2 %v406_v59  ;;  %452 = vmatmul.msk.bf16.vlgmr.msra.gmra.mxu1 %vm190_vm0, %v609_v45 }
  0x16   :  { %264 = vmatpush.bf16.msrb.mxu1 %v438_v60  ;;  %291 = vmatpush.bf16.msrb.mxu3 %v410_v1 }
  0x18   :  { %253 = vmatpush.bf16.msrb.mxu0 %v362_v4 }
  0x19   :  { %279 = vmatpush.bf16.msrb.mxu2 %v370_v7 }
  0x1a   :  { %265 = vmatpush.bf16.msrb.mxu1 %v402_v9  ;;  %292 = vmatpush.bf16.msrb.mxu3 %v374_v12 }
  0x1c   :  { %303 = vmatpush.bf16.msra.mxu0 %v450_v8 }
  0x1e   :  { %266 = vmatpush.bf16.msrb.mxu1 %v366_v16 }
  0x1f   :  { %455 = vmatmul.msk.bf16.vlgmr.msrb.gmra.mxu0 %vm190_vm0, %v609_v45 }
  0x20   :  { %304 = vmatpush.bf16.msra.mxu0 %v414_v15  ;;  %457 = vmatmul.msk.bf16.vlgmr.msrb.gmra.mxu2 %vm190_vm0, %v609_v45 }
  0x21   :  { %458 = vmatmul.msk.bf16.vlgmr.msrb.gmra.mxu3 %vm190_vm0, %v609_v45 }
  0x24   :  { %305 = vmatpush.bf16.msra.mxu0 %v378_v19 }
  0x25   :  { %456 = vmatmul.msk.bf16.vlgmr.msrb.gmra.mxu1 %vm190_vm0, %v609_v45 }
  0x2f   :  { %459 = vmatmul.msk.bf16.vlgmr.msra.gmra.mxu0 %vm190_vm0, %v609_v45 }
  0x80   :  { %v50_v20 = vpop.permute.xlu0 %49 }
  0x8c   :  { %v203_v21 = vpop.f32.mrf.mxu0 }
  0x8d   :  { %v204_v22 = vadd.f32 %v203_v21, %v50_v20 }
  0x8f   :  { %v311_v23 = vmul.f32 0.2, %v204_v22 }
  0x91   :  { %v320_v24 = vmax.f32 %v204_v22, %v311_v23 }
  0x92   :  { %v216_v25 = vpop.f32.mrf.mxu1 }
  0x93   :  { %329 = vst [vmem:[%s728_s3] sm:$0xff] %v320_v24  ;;  %v217_v26 = vadd.f32 %v216_v25, %v50_v20  ;;  %v229_v27 = vpop.f32.mrf.mxu2 }
  0x94   :  { %v242_v28 = vpop.f32.mrf.mxu3  ;;  %v205_v29 = vpop.f32.mrf.mxu0  ;;  %v230_v30 = vadd.f32 %v229_v27, %v50_v20 }
  0x95   :  { %v243_v31 = vadd.f32 %v242_v28, %v50_v20  ;;  %v312_v32 = vmul.f32 0.2, %v217_v26 }
  0x96   :  { %v313_v33 = vmul.f32 0.2, %v230_v30 }
  0x97   :  { %v314_v34 = vmul.f32 0.2, %v243_v31  ;;  %v321_v35 = vmax.f32 %v217_v26, %v312_v32 }
  0x98   :  { %v322_v36 = vmax.f32 %v230_v30, %v313_v33 }
  0x99   :  { %v323_v37 = vmax.f32 %v243_v31, %v314_v34  ;;  %330 = vst [vmem:[%s728_s3 + $0x8] sm:$0xff] %v321_v35 }
  0x9a   :  { %331 = vst [vmem:[%s728_s3 + $0x10] sm:$0xff] %v322_v36  ;;  %v218_v38 = vpop.f32.mrf.mxu1 }
  0x9b   :  { %332 = vst [vmem:[%s728_s3 + $0x18] sm:$0xff] %v323_v37  ;;  %v231_v39 = vpop.f32.mrf.mxu2 }
  0x9c   :  { %v244_v40 = vpop.f32.mrf.mxu3  ;;  %v255_v41 = vpop.f32.mrf.mxu0 }
  0x9d   :  { %v256_v42 = vadd.f32 %v255_v41, %v50_v20 }
  0x9f   :  { %v315_v43 = vmul.f32 0.2, %v256_v42 }
  0xa1   :  { %v324_v44 = vmax.f32 %v256_v42, %v315_v43 }
  0xa2   :  { %v268_v45 = vpop.f32.mrf.mxu1 }
  0xa3   :  { %333 = vst [vmem:[%s728_s3 + $0x20] sm:$0xff] %v324_v44  ;;  %v269_v46 = vadd.f32 %v268_v45, %v50_v20  ;;  %v281_v47 = vpop.f32.mrf.mxu2 }
  0xa4   :  { %v294_v48 = vpop.f32.mrf.mxu3  ;;  %v257_v49 = vpop.f32.mrf.mxu0  ;;  %v282_v50 = vadd.f32 %v281_v47, %v50_v20 }
  0xa5   :  { %v295_v51 = vadd.f32 %v294_v48, %v50_v20  ;;  %v316_v52 = vmul.f32 0.2, %v269_v46 }
  0xa6   :  { %v317_v53 = vmul.f32 0.2, %v282_v50 }
  0xa7   :  { %v318_v54 = vmul.f32 0.2, %v295_v51  ;;  %v325_v55 = vmax.f32 %v269_v46, %v316_v52 }
  0xa8   :  { %v326_v56 = vmax.f32 %v282_v50, %v317_v53 }
  0xa9   :  { %v327_v57 = vmax.f32 %v295_v51, %v318_v54  ;;  %334 = vst [vmem:[%s728_s3 + $0x28] sm:$0xff] %v325_v55 }
  0xaa   :  { %335 = vst [vmem:[%s728_s3 + $0x30] sm:$0xff] %v326_v56  ;;  %v270_v58 = vpop.f32.mrf.mxu1 }
  0xab   :  { %336 = vst [vmem:[%s728_s3 + $0x38] sm:$0xff] %v327_v57  ;;  %v283_v59 = vpop.f32.mrf.mxu2 }
  0xac   :  { %v296_v60 = vpop.f32.mrf.mxu3  ;;  %v307_v61 = vpop.f32.mrf.mxu0 }
  0xad   :  { %v308_v62 = vadd.f32 %v307_v61, %v50_v20 }
  0xaf   :  { %v319_v63 = vmul.f32 0.2, %v308_v62 }
  0xb1   :  { %v328_v0 = vmax.f32 %v308_v62, %v319_v63 }
  0xb3   :  { %338 = vst.msk [vmem:[%s728_s3 + $0x40] sm:$0xff] %vm337_vm1, %v328_v0 }
  0xb4   :  { %v309_v1 = vpop.f32.mrf.mxu0 }

// kernel: _lambda_.4
= control target key start
LH: loop header
LB: loop body
LE: loop exit
PB: predicated region body
PF: predicated region fallthrough
CT: control target
= control target key end

     0   :  { %v421_v23 = vmov 0   ;;  %v158_v52 = vlaneseq  ;;  %vm181_vm3 = vcmask 588800   ;;  %s641_s1 = inlined_call_operand.vmem [shape: bf16[128,200], index: 1, kind: input, shape index: {}]   ;;  %s642_s2 = inlined_call_operand.vmem [shape: f32[16,1], index: 2, kind: input, shape index: {}]   ;;  %s643_s0 = inlined_call_operand.vmem [shape: bf16[16,128], index: 0, kind: input, shape index: {}]   ;;  %s644_s3 = inlined_call_operand.vmem [shape: f32[16,200], index: 3, kind: output, shape index: {}]  }
   0x1   :  { %v388_v0 = vld [vmem:[%s641_s1 + $0x70] sm:$0xf]  ;;  %v410_v1 = vld [vmem:[%s641_s1 + $0x74] sm:$0xf0]  ;;  %v409_v2 = vld [vmem:[%s641_s1 + $0x74] sm:$0xf]  ;;  %412 = vset.pattern.permute.xlu0 %v421_v23 }
   0x2   :  { %v389_v3 = vor.u32 %v410_v1, %v388_v0  ;;  %v390_v4 = vld [vmem:[%s641_s1 + $0x78] sm:$0xf0]  ;;  %v380_v5 = vld [vmem:[%s641_s1 + $0x60] sm:$0xf]  ;;  %v408_v6 = vld [vmem:[%s641_s1 + $0x64] sm:$0xf0] }
   0x3   :  { %v393_v7 = vor.u32 %v409_v2, %v390_v4  ;;  %v407_v8 = vld [vmem:[%s641_s1 + $0x64] sm:$0xf]  ;;  %v382_v9 = vld [vmem:[%s641_s1 + $0x68] sm:$0xf0]  ;;  %v381_v10 = vor.u32 %v408_v6, %v380_v5  ;;  %v372_v12 = vld [vmem:[%s641_s1 + $0x50] sm:$0xf] }
   0x4   :  { %130 = vmatpush.bf16.msra.mxu0 %v389_v3  ;;  %v385_v11 = vor.u32 %v407_v8, %v382_v9  ;;  %v406_v13 = vld [vmem:[%s641_s1 + $0x54] sm:$0xf0]  ;;  %v405_v14 = vld [vmem:[%s641_s1 + $0x54] sm:$0xf]  ;;  %v374_v15 = vld [vmem:[%s641_s1 + $0x58] sm:$0xf0] }
   0x5   :  { %144 = vmatpush.bf16.msra.mxu1 %v393_v7  ;;  %v373_v16 = vor.u32 %v406_v13, %v372_v12  ;;  %v377_v17 = vor.u32 %v405_v14, %v374_v15  ;;  %v364_v18 = vld [vmem:[%s641_s1 + $0x40] sm:$0xf]  ;;  %v404_v19 = vld [vmem:[%s641_s1 + $0x44] sm:$0xf0]  ;;  %v403_v20 = vld [vmem:[%s641_s1 + $0x44] sm:$0xf] }
   0x6   :  { %v366_v21 = vld [vmem:[%s641_s1 + $0x48] sm:$0xf0]  ;;  %v365_v22 = vor.u32 %v404_v19, %v364_v18  ;;  %v32_v24 = vld [vmem:[%s642_s2] sm:$0xff]  ;;  %v356_v26 = vld [vmem:[%s641_s1 + $0x30] sm:$0xf]  ;;  %v547_v53 = vand.u32 127, %v158_v52 }
   0x7   :  { %v369_v25 = vor.u32 %v403_v20, %v366_v21  ;;  %v402_v27 = vld [vmem:[%s641_s1 + $0x34] sm:$0xf0]  ;;  %36 = vperm.xlu0 %412, %v32_v24   ;;  %v401_v28 = vld [vmem:[%s641_s1 + $0x34] sm:$0xf]  ;;  %v358_v29 = vld [vmem:[%s641_s1 + $0x38] sm:$0xf0] }
   0x8   :  { %131 = vmatpush.bf16.msra.mxu0 %v381_v10  ;;  %v357_v30 = vor.u32 %v402_v27, %v356_v26  ;;  %v361_v31 = vor.u32 %v401_v28, %v358_v29  ;;  %v348_v32 = vld [vmem:[%s641_s1 + $0x20] sm:$0xf]  ;;  %v400_v33 = vld [vmem:[%s641_s1 + $0x24] sm:$0xf0]  ;;  %v399_v34 = vld [vmem:[%s641_s1 + $0x24] sm:$0xf] }
   0x9   :  { %145 = vmatpush.bf16.msra.mxu1 %v385_v11  ;;  %v350_v35 = vld [vmem:[%s641_s1 + $0x28] sm:$0xf0]  ;;  %v349_v37 = vor.u32 %v400_v33, %v348_v32  ;;  %v340_v39 = vld [vmem:[%s641_s1 + $0x10] sm:$0xf]  ;;  %v398_v40 = vld [vmem:[%s641_s1 + $0x14] sm:$0xf0] }
   0xa   :  { %v33_v36 = vld [vmem:[%s642_s2 + $0x8] sm:$0xff]  ;;  %v353_v38 = vor.u32 %v399_v34, %v350_v35  ;;  %v397_v41 = vld [vmem:[%s641_s1 + $0x14] sm:$0xf]  ;;  %v342_v42 = vld [vmem:[%s641_s1 + $0x18] sm:$0xf0]  ;;  %v341_v43 = vor.u32 %v398_v40, %v340_v39  ;;  %v550_v54 = vadd.s32 128, %v547_v53 }
   0xb   :  { %v345_v44 = vor.u32 %v397_v41, %v342_v42  ;;  %v332_v45 = vld [vmem:[%s641_s1] sm:$0xf]  ;;  %v396_v46 = vld [vmem:[%s641_s1 + $0x4] sm:$0xf0]  ;;  %v395_v47 = vld [vmem:[%s641_s1 + $0x4] sm:$0xf] }
   0xc   :  { %132 = vmatpush.bf16.msra.mxu0 %v373_v16  ;;  %v334_v48 = vld [vmem:[%s641_s1 + $0x8] sm:$0xf0]  ;;  %v333_v49 = vor.u32 %v396_v46, %v332_v45  ;;  %v394_v51 = vld [vmem:[%s643_s0] sm:$0xff]  ;;  %vm163_vm0 = vcmp.lt.s32.totalorder %v547_v53, 100  ;;  %vm167_vm1 = vcmp.ge.s32.totalorder %v547_v53, 100  ;;  %vm170_vm2 = vcmp.lt.s32.totalorder %v550_v54, 200 }
   0xd   :  { %146 = vmatpush.bf16.msra.mxu1 %v377_v17  ;;  %v337_v50 = vor.u32 %v395_v47, %v334_v48 }
   0xf   :  { %41 = vperm.xlu0 %412, %v33_v36  }
  0x10   :  { %133 = vmatpush.bf16.msra.mxu0 %v365_v22 }
  0x11   :  { %147 = vmatpush.bf16.msra.mxu1 %v369_v25 }
  0x14   :  { %134 = vmatpush.bf16.msra.mxu0 %v357_v30 }
  0x15   :  { %148 = vmatpush.bf16.msra.mxu1 %v361_v31 }
  0x18   :  { %135 = vmatpush.bf16.msra.mxu0 %v349_v37 }
  0x19   :  { %149 = vmatpush.bf16.msra.mxu1 %v353_v38 }
  0x1c   :  { %136 = vmatpush.bf16.msra.mxu0 %v341_v43 }
  0x1d   :  { %150 = vmatpush.bf16.msra.mxu1 %v345_v44 }
  0x20   :  { %137 = vmatpush.bf16.msra.mxu0 %v333_v49 }
  0x21   :  { %151 = vmatpush.bf16.msra.mxu1 %v337_v50 }
  0x23   :  { %138 = vmatmul.bf16.vlgmr.msra.gmra.mxu0 %v394_v51 }
  0x24   :  { %152 = vmatmul.bf16.vlgmr.msra.gmra.mxu1 %v394_v51 }
  0x79   :  { %v37_v55 = vpop.permute.xlu0 %36 }
  0x81   :  { %v42_v1 = vpop.permute.xlu0 %41 }
  0xa0   :  { %v139_v56 = vpop.f32.mrf.mxu0 }
  0xa1   :  { %v140_v57 = vadd.f32 %v139_v56, %v37_v55  ;;  %v153_v58 = vpop.f32.mrf.mxu1 }
  0xa2   :  { %v154_v59 = vadd.f32 %v153_v58, %v37_v55 }
  0xa3   :  { %v177_v60 = vsel %vm163_vm0, %v140_v57, 0.0  ;;  %v200_v61 = vsel %vm167_vm1, %v140_v57, 0.0 }
  0xa4   :  { %184 = vadd.xlane.f32.xlu1 %v177_v60  ;;  %v201_v62 = vsel %vm170_vm2, %v154_v59, 0.0 }
  0xa5   :  { %v204_v63 = vsel %vm181_vm3, %v201_v62, 0.0 }
  0xa6   :  { %v205_v0 = vadd.f32 %v204_v63, %v200_v61 }
  0xa8   :  { %206 = vadd.xlane.f32.xlu2 %v205_v0  ;;  %v141_v2 = vpop.f32.mrf.mxu0 }
  0xa9   :  { %v142_v3 = vadd.f32 %v141_v2, %v42_v1  ;;  %v155_v4 = vpop.f32.mrf.mxu1 }
  0xaa   :  { %v156_v5 = vadd.f32 %v155_v4, %v42_v1 }
  0xab   :  { %v179_v6 = vsel %vm163_vm0, %v142_v3, 0.0  ;;  %v202_v7 = vsel %vm167_vm1, %v142_v3, 0.0 }
  0xac   :  { %v203_v8 = vsel %vm170_vm2, %v156_v5, 0.0  ;;  %188 = vadd.xlane.f32.xlu1 %v179_v6 }
  0xad   :  { %v208_v9 = vsel %vm181_vm3, %v203_v8, 0.0 }
  0xae   :  { %v209_v10 = vadd.f32 %v208_v9, %v202_v7 }
  0xb0   :  { %210 = vadd.xlane.f32.xlu2 %v209_v10 }
 0x117   :  { %v185_v11 = vpop.xlane.xlu1 %184 }
 0x118   :  { %v190_v12 = vmul.f32 0.01, %v185_v11 }
 0x11a   :  { %v192_v15 = vsel %vm163_vm0, %v190_v12, 0.0 }
 0x11b   :  { %v207_v13 = vpop.xlane.xlu2 %206 }
 0x11c   :  { %v212_v14 = vmul.f32 0.01, %v207_v13 }
 0x11e   :  { %v214_v16 = vsel %vm167_vm1, %v212_v14, %v192_v15  ;;  %v215_v17 = vsel %vm170_vm2, %v212_v14, 0.0 }
 0x11f   :  { %v575_v18 = vsub.f32 %v154_v59, %v215_v17  ;;  %v189_v19 = vpop.xlane.xlu1 %188  ;;  %v577_v20 = vsub.f32 %v140_v57, %v214_v16 }
 0x120   :  { %v191_v21 = vmul.f32 0.01, %v189_v19 }
 0x121   :  { %v222_v22 = vmul.f32 %v577_v20, %v577_v20  ;;  %v223_v23 = vmul.f32 %v575_v18, %v575_v18 }
 0x122   :  { %v194_v30 = vsel %vm163_vm0, %v191_v21, 0.0 }
 0x123   :  { %v211_v24 = vpop.xlane.xlu2 %210  ;;  %v226_v25 = vsel %vm163_vm0, %v222_v22, 0.0  ;;  %v244_v26 = vsel %vm167_vm1, %v222_v22, 0.0  ;;  %v245_v27 = vsel %vm170_vm2, %v223_v23, 0.0 }
 0x124   :  { %v213_v28 = vmul.f32 0.01, %v211_v24  ;;  %232 = vadd.xlane.f32.xlu0 %v226_v25  ;;  %v248_v29 = vsel %vm181_vm3, %v245_v27, 0.0 }
 0x125   :  { %v249_v31 = vadd.f32 %v248_v29, %v244_v26 }
 0x126   :  { %v216_v32 = vsel %vm167_vm1, %v213_v28, %v194_v30  ;;  %v217_v33 = vsel %vm170_vm2, %v213_v28, 0.0 }
 0x127   :  { %v596_v34 = vsub.f32 %v156_v5, %v217_v33  ;;  %250 = vadd.xlane.f32.xlu2 %v249_v31  ;;  %v598_v35 = vsub.f32 %v142_v3, %v216_v32 }
 0x129   :  { %v224_v36 = vmul.f32 %v598_v35, %v598_v35  ;;  %v225_v37 = vmul.f32 %v596_v34, %v596_v34 }
 0x12b   :  { %v228_v38 = vsel %vm163_vm0, %v224_v36, 0.0  ;;  %v247_v39 = vsel %vm170_vm2, %v225_v37, 0.0  ;;  %v246_v40 = vsel %vm167_vm1, %v224_v36, 0.0 }
 0x12c   :  { %236 = vadd.xlane.f32.xlu1 %v228_v38  ;;  %v252_v41 = vsel %vm181_vm3, %v247_v39, 0.0 }
 0x12d   :  { %v253_v42 = vadd.f32 %v252_v41, %v246_v40 }
 0x134   :  { %254 = vadd.xlane.f32.xlu1 %v253_v42 }
 0x197   :  { %v233_v43 = vpop.xlane.xlu0 %232 }
 0x198   :  { %v238_v44 = vmul.f32 0.01, %v233_v43 }
 0x19a   :  { %v251_v45 = vpop.xlane.xlu2 %250  ;;  %v240_v47 = vsel %vm163_vm0, %v238_v44, 0.0 }
 0x19b   :  { %v256_v46 = vmul.f32 0.01, %v251_v45 }
 0x19d   :  { %v258_v48 = vsel %vm167_vm1, %v256_v46, %v240_v47  ;;  %v259_v49 = vsel %vm170_vm2, %v256_v46, 0.0 }
 0x19e   :  { %v262_v50 = vadd.f32 1e-05, %v258_v48  ;;  %v263_v51 = vadd.f32 1e-05, %v259_v49 }
 0x19f   :  { %v237_v52 = vpop.xlane.xlu1 %236 }
 0x1a0   :  { %413 = vrsqrt.f32 %v262_v50  ;;  %v239_v55 = vmul.f32 0.01, %v237_v52  ;;  %vm272_vm6 = vweird.f32 %v262_v50  ;;  %vm282_vm8 = vweird.f32 %v263_v51 }
 0x1a1   :  { %415 = vrsqrt.f32 %v263_v51 }
 0x1a2   :  { %v242_v63 = vsel %vm163_vm0, %v239_v55, 0.0 }
 0x1a6   :  { %v414_v56 = vpop.eup %413 }
 0x1a7   :  { %v416_v57 = vpop.eup %415  ;;  %v267_v58 = vmul.f32 %v414_v56, %v262_v50  ;;  %v255_v59 = vpop.xlane.xlu1 %254  ;;  %vm273_vm4 = vweird.f32 %v414_v56 }
 0x1a8   :  { %v277_v60 = vmul.f32 %v416_v57, %v263_v51  ;;  %v257_v61 = vmul.f32 0.01, %v255_v59  ;;  %vm283_vm5 = vweird.f32 %v416_v57  ;;  %vm274_vm7 = vmor %vm272_vm6, %vm273_vm4 }
 0x1a9   :  { %v268_v62 = vmul.f32 %v414_v56, %v267_v58  ;;  %vm284_vm9 = vmor %vm282_vm8, %vm283_vm5 }
 0x1aa   :  { %v278_v0 = vmul.f32 %v416_v57, %v277_v60  ;;  %v260_v1 = vsel %vm167_vm1, %v257_v61, %v242_v63  ;;  %v261_v2 = vsel %vm170_vm2, %v257_v61, 0.0 }
 0x1ab   :  { %v269_v3 = vmul.f32 0.5, %v268_v62  ;;  %v264_v4 = vadd.f32 1e-05, %v260_v1  ;;  %v265_v5 = vadd.f32 1e-05, %v261_v2 }
 0x1ac   :  { %v279_v6 = vmul.f32 0.5, %v278_v0 }
 0x1ad   :  { %v270_v7 = vsub.f32 1.5, %v269_v3  ;;  %417 = vrsqrt.f32 %v264_v4  ;;  %vm292_vm12 = vweird.f32 %v264_v4  ;;  %vm302_vm14 = vweird.f32 %v265_v5 }
 0x1ae   :  { %v280_v8 = vsub.f32 1.5, %v279_v6  ;;  %419 = vrsqrt.f32 %v265_v5 }
 0x1af   :  { %v271_v9 = vmul.f32 %v414_v56, %v270_v7 }
 0x1b0   :  { %v281_v10 = vmul.f32 %v416_v57, %v280_v8 }
 0x1b1   :  { %v275_v53 = vsel %vm274_vm7, %v414_v56, %v271_v9 }
 0x1b2   :  { %v285_v11 = vsel %vm284_vm9, %v416_v57, %v281_v10  ;;  %v306_v54 = vmul.f32 %v275_v53, %v577_v20 }
 0x1b3   :  { %v418_v12 = vpop.eup %417  ;;  %v307_v13 = vmul.f32 %v285_v11, %v575_v18 }
 0x1b4   :  { %v420_v14 = vpop.eup %419  ;;  %v310_v15 = vmul.f32 0.2, %v306_v54  ;;  %v287_v16 = vmul.f32 %v418_v12, %v264_v4  ;;  %vm293_vm10 = vweird.f32 %v418_v12 }
 0x1b5   :  { %v311_v17 = vmul.f32 0.2, %v307_v13  ;;  %v297_v19 = vmul.f32 %v420_v14, %v265_v5  ;;  %vm303_vm11 = vweird.f32 %v420_v14  ;;  %vm294_vm13 = vmor %vm292_vm12, %vm293_vm10 }
 0x1b6   :  { %v314_v21 = vmax.f32 %v306_v54, %v310_v15  ;;  %v288_v22 = vmul.f32 %v418_v12, %v287_v16  ;;  %vm304_vm15 = vmor %vm302_vm14, %vm303_vm11 }
 0x1b7   :  { %v315_v23 = vmax.f32 %v307_v13, %v311_v17  ;;  %v298_v24 = vmul.f32 %v420_v14, %v297_v19 }
 0x1b8   :  { %318 = vst [vmem:[%s644_s3] sm:$0xff] %v314_v21  ;;  %v289_v25 = vmul.f32 0.5, %v288_v22 }
 0x1b9   :  { %319 = vst.msk [vmem:[%s644_s3 + $0x8] sm:$0xff] %vm181_vm3, %v315_v23  ;;  %v299_v18 = vmul.f32 0.5, %v298_v24 }
 0x1ba   :  { %v290_v20 = vsub.f32 1.5, %v289_v25 }
 0x1bb   :  { %v300_v26 = vsub.f32 1.5, %v299_v18 }
 0x1bc   :  { %v291_v27 = vmul.f32 %v418_v12, %v290_v20 }
 0x1bd   :  { %v301_v28 = vmul.f32 %v420_v14, %v300_v26 }
 0x1be   :  { %v295_v29 = vsel %vm294_vm13, %v418_v12, %v291_v27 }
 0x1bf   :  { %v305_v30 = vsel %vm304_vm15, %v420_v14, %v301_v28  ;;  %v308_v31 = vmul.f32 %v295_v29, %v598_v35 }
 0x1c0   :  { %v309_v32 = vmul.f32 %v305_v30, %v596_v34 }
 0x1c1   :  { %v312_v33 = vmul.f32 0.2, %v308_v31 }
 0x1c2   :  { %v313_v36 = vmul.f32 0.2, %v309_v32 }
 0x1c3   :  { %v316_v37 = vmax.f32 %v308_v31, %v312_v33 }
 0x1c4   :  { %v317_v38 = vmax.f32 %v309_v32, %v313_v36 }
 0x1c5   :  { %320 = vst [vmem:[%s644_s3 + $0x10] sm:$0xff] %v316_v37 }
 0x1c6   :  { %321 = vst.msk [vmem:[%s644_s3 + $0x18] sm:$0xff] %vm181_vm3, %v317_v38 }

// kernel: _lambda_.5
= control target key start
LH: loop header
LB: loop body
LE: loop exit
PB: predicated region body
PF: predicated region fallthrough
CT: control target
= control target key end

     0   :  { %v628_v4 = vmov 0   ;;  %v238_v33 = vlaneseq  ;;  %vm252_vm4 = vcmask 261120   ;;  %s919_s1 = inlined_call_operand.vmem [shape: bf16[256,32], index: 1, kind: input, shape index: {}]   ;;  %s920_s2 = inlined_call_operand.vmem [shape: f32[32,1], index: 2, kind: input, shape index: {}]   ;;  %s921_s0 = inlined_call_operand.vmem [shape: bf16[32,256], index: 0, kind: input, shape index: {}]   ;;  %s922_s3 = inlined_call_operand.vmem [shape: f32[32,32], index: 3, kind: input, shape index: {}]   ;;  %s923_s5 = inlined_call_operand.vmem [shape: f32[32,32], index: 5, kind: output, shape index: {0}]   ;;  %s924_s4 = inlined_call_operand.<no memory space> [shape: f32[1,1], index: 4, kind: input, shape index: {}]   ;;  %s925_s6 = inlined_call_operand.vmem [shape: f32[1,32], index: 6, kind: output, shape index: {1}]  }
   0x1   :  { %v591_v0 = vld [vmem:[%s919_s1 + $0x38] sm:$0xff]  ;;  %v590_v2 = vld [vmem:[%s919_s1 + $0x30] sm:$0xff]  ;;  %617 = vset.pattern.permute.xlu0 %v628_v4  ;;  %618 = vset.pattern.permute.xlu1 %v628_v4  ;;  %v589_v5 = vld [vmem:[%s919_s1 + $0x28] sm:$0xff] }
   0x2   :  { %v599_v1 = vld [vmem:[%s919_s1 + $0x78] sm:$0xff]  ;;  %200 = vmatpush.bf16.msra.mxu0 %v591_v0  ;;  %v598_v3 = vld [vmem:[%s919_s1 + $0x70] sm:$0xff]  ;;  %600 = vmatpush.bf16.msra.mxu2 %v591_v0  ;;  %v597_v6 = vld [vmem:[%s919_s1 + $0x68] sm:$0xff]  ;;  %v748_v34 = vand.u32 127, %v238_v33 }
   0x3   :  { %219 = vmatpush.bf16.msra.mxu1 %v599_v1  ;;  %608 = vmatpush.bf16.msra.mxu3 %v599_v1  ;;  %v60_v7 = vld [vmem:[%s920_s2] sm:$0xff]  ;;  %v62_v8 = vld [vmem:[%s920_s2 + $0x10] sm:$0xff]  ;;  %v61_v11 = vld [vmem:[%s920_s2 + $0x8] sm:$0xff] }
   0x4   :  { %619 = vset.pattern.permute.xlu2 %v628_v4  ;;  %66 = vperm.xlu0 %617, %v60_v7   ;;  %v588_v9 = vld [vmem:[%s919_s1 + $0x20] sm:$0xff]  ;;  %v587_v12 = vld [vmem:[%s919_s1 + $0x18] sm:$0xff]  ;;  %v586_v15 = vld [vmem:[%s919_s1 + $0x10] sm:$0xff]  ;;  %vm243_vm0 = vcmp.ge.s32.totalorder %v748_v34, 16  ;;  %vm244_vm1 = vcmp.lt.s32.totalorder %v748_v34, 32  ;;  %vm241_vm3 = vcmp.lt.s32.totalorder %v748_v34, 16 }
   0x5   :  { %76 = vperm.xlu1 %618, %v62_v8   ;;  %v596_v10 = vld [vmem:[%s919_s1 + $0x60] sm:$0xff]  ;;  %v595_v13 = vld [vmem:[%s919_s1 + $0x58] sm:$0xff]  ;;  %v594_v16 = vld [vmem:[%s919_s1 + $0x50] sm:$0xff] }
   0x6   :  { %201 = vmatpush.bf16.msra.mxu0 %v590_v2  ;;  %601 = vmatpush.bf16.msra.mxu2 %v590_v2  ;;  %v63_v14 = vld [vmem:[%s920_s2 + $0x18] sm:$0xff]  ;;  %v585_v17 = vld [vmem:[%s919_s1 + $0x8] sm:$0xff]  ;;  %v584_v19 = vld [vmem:[%s919_s1] sm:$0xff] }
   0x7   :  { %220 = vmatpush.bf16.msra.mxu1 %v598_v3  ;;  %609 = vmatpush.bf16.msra.mxu3 %v598_v3  ;;  %v593_v18 = vld [vmem:[%s919_s1 + $0x48] sm:$0xff]  ;;  %v592_v20 = vld [vmem:[%s919_s1 + $0x40] sm:$0xff]  ;;  %v510_v25 = vld [vmem:[%s921_s0 + $0x10] sm:$0xf] }
   0x8   :  { %v502_v21 = vld [vmem:[%s921_s0] sm:$0xf]  ;;  %v581_v22 = vld [vmem:[%s921_s0 + $0x4] sm:$0xf0]  ;;  %v580_v23 = vld [vmem:[%s921_s0 + $0x4] sm:$0xf] }
   0x9   :  { %v504_v24 = vld [vmem:[%s921_s0 + $0x8] sm:$0xf0]  ;;  %v583_v26 = vld [vmem:[%s921_s0 + $0x14] sm:$0xf0]  ;;  %v582_v27 = vld [vmem:[%s921_s0 + $0x14] sm:$0xf]  ;;  %v503_v29 = vor.u32 %v581_v22, %v502_v21 }
   0xa   :  { %202 = vmatpush.bf16.msra.mxu0 %v589_v5  ;;  %602 = vmatpush.bf16.msra.mxu2 %v589_v5  ;;  %v512_v28 = vld [vmem:[%s921_s0 + $0x18] sm:$0xf0]  ;;  %v507_v30 = vor.u32 %v580_v23, %v504_v24  ;;  %v511_v31 = vor.u32 %v583_v26, %v510_v25  ;;  %vm752_vm2 = vmand %vm243_vm0, %vm244_vm1  ;;  %vm490_vm1 = vcmask 253952  }
   0xb   :  { %221 = vmatpush.bf16.msra.mxu1 %v597_v6  ;;  %610 = vmatpush.bf16.msra.mxu3 %v597_v6  ;;  %v515_v32 = vor.u32 %v582_v27, %v512_v28 }
   0xc   :  { %71 = vperm.xlu0 %617, %v61_v11  }
   0xd   :  { %81 = vperm.xlu1 %618, %v63_v14  }
   0xe   :  { %203 = vmatpush.bf16.msra.mxu0 %v588_v9  ;;  %603 = vmatpush.bf16.msra.mxu2 %v588_v9 }
   0xf   :  { %222 = vmatpush.bf16.msra.mxu1 %v596_v10  ;;  %611 = vmatpush.bf16.msra.mxu3 %v596_v10 }
  0x12   :  { %204 = vmatpush.bf16.msra.mxu0 %v587_v12  ;;  %604 = vmatpush.bf16.msra.mxu2 %v587_v12 }
  0x13   :  { %223 = vmatpush.bf16.msra.mxu1 %v595_v13  ;;  %612 = vmatpush.bf16.msra.mxu3 %v595_v13 }
  0x16   :  { %205 = vmatpush.bf16.msra.mxu0 %v586_v15  ;;  %605 = vmatpush.bf16.msra.mxu2 %v586_v15 }
  0x17   :  { %224 = vmatpush.bf16.msra.mxu1 %v594_v16  ;;  %613 = vmatpush.bf16.msra.mxu3 %v594_v16 }
  0x1a   :  { %206 = vmatpush.bf16.msra.mxu0 %v585_v17  ;;  %606 = vmatpush.bf16.msra.mxu2 %v585_v17 }
  0x1b   :  { %225 = vmatpush.bf16.msra.mxu1 %v593_v18  ;;  %614 = vmatpush.bf16.msra.mxu3 %v593_v18 }
  0x1e   :  { %207 = vmatpush.bf16.msra.mxu0 %v584_v19  ;;  %607 = vmatpush.bf16.msra.mxu2 %v584_v19 }
  0x1f   :  { %226 = vmatpush.bf16.msra.mxu1 %v592_v20  ;;  %615 = vmatpush.bf16.msra.mxu3 %v592_v20 }
  0x21   :  { %208 = vmatmul.bf16.vlgmr.msra.gmra.mxu0 %v503_v29  ;;  %213 = vmatmul.bf16.vlgmr.msra.gmra.mxu2 %v511_v31 }
  0x22   :  { %227 = vmatmul.bf16.vlgmr.msra.gmra.mxu1 %v507_v30  ;;  %232 = vmatmul.bf16.vlgmr.msra.gmra.mxu3 %v515_v32 }
  0x76   :  { %v67_v35 = vpop.permute.xlu0 %66 }
  0x77   :  { %v77_v46 = vpop.permute.xlu1 %76 }
  0x7e   :  { %v72_v45 = vpop.permute.xlu0 %71 }
  0x7f   :  { %v82_v61 = vpop.permute.xlu1 %81 }
  0x9e   :  { %v209_v36 = vpop.f32.mrf.mxu0 }
  0x9f   :  { %v228_v37 = vpop.f32.mrf.mxu1  ;;  %v210_v38 = vadd.f32 %v209_v36, %v67_v35 }
  0xa1   :  { %v229_v40 = vadd.f32 %v228_v37, %v210_v38 }
  0xa3   :  { %v275_v41 = vsel %vm752_vm2, %v229_v40, 0.0  ;;  %v248_v42 = vsel %vm241_vm3, %v229_v40, 0.0 }
  0xa4   :  { %v279_v43 = vsel %vm252_vm4, %v275_v41, 0.0  ;;  %v253_v44 = vsel %vm252_vm4, %v248_v42, 0.0  ;;  %v214_v48 = vpop.f32.mrf.mxu2 }
  0xa5   :  { %280 = vadd.xlane.f32.xlu0 %v279_v43  ;;  %254 = vadd.xlane.f32.xlu2 %v253_v44  ;;  %v215_v50 = vadd.f32 %v214_v48, %v77_v46  ;;  %v233_v53 = vpop.f32.mrf.mxu3 }
  0xa6   :  { %v211_v47 = vpop.f32.mrf.mxu0 }
  0xa7   :  { %v212_v49 = vadd.f32 %v211_v47, %v72_v45  ;;  %v230_v51 = vpop.f32.mrf.mxu1  ;;  %v234_v54 = vadd.f32 %v233_v53, %v215_v50 }
  0xa9   :  { %v231_v52 = vadd.f32 %v230_v51, %v212_v49  ;;  %v250_v59 = vsel %vm241_vm3, %v234_v54, 0.0  ;;  %v277_v0 = vsel %vm752_vm2, %v234_v54, 0.0 }
  0xaa   :  { %v259_v60 = vsel %vm252_vm4, %v250_v59, 0.0  ;;  %v285_v2 = vsel %vm252_vm4, %v277_v0, 0.0 }
  0xab   :  { %v276_v55 = vsel %vm752_vm2, %v231_v52, 0.0  ;;  %v249_v56 = vsel %vm241_vm3, %v231_v52, 0.0 }
  0xac   :  { %v282_v57 = vsel %vm252_vm4, %v276_v55, 0.0  ;;  %v256_v58 = vsel %vm252_vm4, %v249_v56, 0.0  ;;  %v216_v62 = vpop.f32.mrf.mxu2 }
  0xad   :  { %283 = vadd.xlane.f32.xlu1 %v282_v57  ;;  %257 = vadd.xlane.f32.xlu2 %v256_v58  ;;  %v217_v63 = vadd.f32 %v216_v62, %v82_v61  ;;  %v235_v1 = vpop.f32.mrf.mxu3 }
  0xaf   :  { %v236_v3 = vadd.f32 %v235_v1, %v217_v63 }
  0xb1   :  { %v251_v4 = vsel %vm241_vm3, %v236_v3, 0.0  ;;  %v278_v6 = vsel %vm752_vm2, %v236_v3, 0.0 }
  0xb2   :  { %v262_v5 = vsel %vm252_vm4, %v251_v4, 0.0  ;;  %v288_v7 = vsel %vm252_vm4, %v278_v6, 0.0 }
  0xb5   :  { %260 = vadd.xlane.f32.xlu2 %v259_v60 }
  0xbd   :  { %286 = vadd.xlane.f32.xlu2 %v285_v2 }
  0xc5   :  { %263 = vadd.xlane.f32.xlu2 %v262_v5 }
  0xcd   :  { %289 = vadd.xlane.f32.xlu2 %v288_v7 }
 0x118   :  { %v281_v8 = vpop.xlane.xlu0 %280  ;;  %v255_v9 = vpop.xlane.xlu2 %254 }
 0x119   :  { %v291_v10 = vmul.f32 0.0625, %v281_v8  ;;  %v265_v11 = vmul.f32 0.0625, %v255_v9 }
 0x11b   :  { %v269_v12 = vsel %vm241_vm3, %v265_v11, 0.0 }
 0x11c   :  { %v295_v13 = vsel %vm752_vm2, %v291_v10, %v269_v12 }
 0x11d   :  { %v785_v14 = vsub.f32 %v229_v40, %v295_v13 }
 0x11f   :  { %v303_v15 = vmul.f32 %v785_v14, %v785_v14 }
 0x120   :  { %v284_v16 = vpop.xlane.xlu1 %283  ;;  %v258_v17 = vpop.xlane.xlu2 %257 }
 0x121   :  { %v292_v18 = vmul.f32 0.0625, %v284_v16  ;;  %v266_v19 = vmul.f32 0.0625, %v258_v17  ;;  %v331_v20 = vsel %vm752_vm2, %v303_v15, 0.0  ;;  %v307_v21 = vsel %vm241_vm3, %v303_v15, 0.0 }
 0x122   :  { %v335_v22 = vsel %vm252_vm4, %v331_v20, 0.0  ;;  %v311_v23 = vsel %vm252_vm4, %v307_v21, 0.0 }
 0x123   :  { %v270_v24 = vsel %vm241_vm3, %v266_v19, 0.0  ;;  %336 = vadd.xlane.f32.xlu0 %v335_v22  ;;  %312 = vadd.xlane.f32.xlu2 %v311_v23 }
 0x124   :  { %v296_v25 = vsel %vm752_vm2, %v292_v18, %v270_v24  ;;  %v415_v18 = vld [vmem:[%s922_s3] sm:$0xff] }
 0x125   :  { %v799_v26 = vsub.f32 %v231_v52, %v296_v25 }
 0x127   :  { %v304_v27 = vmul.f32 %v799_v26, %v799_v26 }
 0x128   :  { %v261_v28 = vpop.xlane.xlu2 %260 }
 0x129   :  { %v332_v29 = vsel %vm752_vm2, %v304_v27, 0.0  ;;  %v267_v31 = vmul.f32 0.0625, %v261_v28  ;;  %v308_v46 = vsel %vm241_vm3, %v304_v27, 0.0 }
 0x12a   :  { %v338_v30 = vsel %vm252_vm4, %v332_v29, 0.0  ;;  %v314_v49 = vsel %vm252_vm4, %v308_v46, 0.0 }
 0x12b   :  { %339 = vadd.xlane.f32.xlu1 %v338_v30  ;;  %v271_v35 = vsel %vm241_vm3, %v267_v31, 0.0 }
 0x130   :  { %v287_v32 = vpop.xlane.xlu2 %286 }
 0x131   :  { %v293_v33 = vmul.f32 0.0625, %v287_v32 }
 0x133   :  { %v297_v36 = vsel %vm752_vm2, %v293_v33, %v271_v35 }
 0x134   :  { %v810_v37 = vsub.f32 %v234_v54, %v297_v36 }
 0x136   :  { %v305_v38 = vmul.f32 %v810_v37, %v810_v37 }
 0x138   :  { %v264_v40 = vpop.xlane.xlu2 %263  ;;  %v333_v41 = vsel %vm752_vm2, %v305_v38, 0.0  ;;  %v309_v42 = vsel %vm241_vm3, %v305_v38, 0.0 }
 0x139   :  { %v341_v43 = vsel %vm252_vm4, %v333_v41, 0.0  ;;  %v317_v44 = vsel %vm252_vm4, %v309_v42, 0.0  ;;  %v268_v45 = vmul.f32 0.0625, %v264_v40 }
 0x13a   :  { %342 = vadd.xlane.f32.xlu0 %v341_v43  ;;  %318 = vadd.xlane.f32.xlu2 %v317_v44 }
 0x13b   :  { %v272_v50 = vsel %vm241_vm3, %v268_v45, 0.0 }
 0x140   :  { %v290_v47 = vpop.xlane.xlu2 %289 }
 0x141   :  { %v294_v48 = vmul.f32 0.0625, %v290_v47 }
 0x142   :  { %315 = vadd.xlane.f32.xlu2 %v314_v49 }
 0x143   :  { %v298_v51 = vsel %vm752_vm2, %v294_v48, %v272_v50 }
 0x144   :  { %v827_v52 = vsub.f32 %v236_v3, %v298_v51 }
 0x146   :  { %v306_v53 = vmul.f32 %v827_v52, %v827_v52 }
 0x148   :  { %v334_v54 = vsel %vm752_vm2, %v306_v53, 0.0  ;;  %v310_v55 = vsel %vm241_vm3, %v306_v53, 0.0 }
 0x149   :  { %v344_v56 = vsel %vm252_vm4, %v334_v54, 0.0  ;;  %v320_v57 = vsel %vm252_vm4, %v310_v55, 0.0 }
 0x14a   :  { %345 = vadd.xlane.f32.xlu2 %v344_v56  ;;  %321 = vadd.xlane.f32.xlu1 %v320_v57  ;;  %v417_v57 = vld [vmem:[%s922_s3 + $0x10] sm:$0xff] }
 0x196   :  { %v337_v58 = vpop.xlane.xlu0 %336  ;;  %v313_v59 = vpop.xlane.xlu2 %312 }
 0x197   :  { %v347_v60 = vmul.f32 0.0625, %v337_v58  ;;  %v323_v61 = vmul.f32 0.0625, %v313_v59 }
 0x199   :  { %v327_v62 = vsel %vm241_vm3, %v323_v61, 0.0 }
 0x19a   :  { %v351_v63 = vsel %vm752_vm2, %v347_v60, %v327_v62 }
 0x19b   :  { %v355_v0 = vadd.f32 1e-05, %v351_v63 }
 0x19d   :  { %620 = vrsqrt.f32 %v355_v0  ;;  %vm365_vm6 = vweird.f32 %v355_v0 }
 0x19e   :  { %v340_v20 = vpop.xlane.xlu1 %339 }
 0x19f   :  { %v348_v23 = vmul.f32 0.0625, %v340_v20 }
 0x1a3   :  { %v621_v1 = vpop.eup %620 }
 0x1a4   :  { %v360_v2 = vmul.f32 %v621_v1, %v355_v0  ;;  %vm366_vm5 = vweird.f32 %v621_v1 }
 0x1a5   :  { %vm367_vm7 = vmor %vm365_vm6, %vm366_vm5 }
 0x1a6   :  { %v361_v3 = vmul.f32 %v621_v1, %v360_v2 }
 0x1a8   :  { %v362_v4 = vmul.f32 0.5, %v361_v3 }
 0x1aa   :  { %v363_v5 = vsub.f32 1.5, %v362_v4 }
 0x1ac   :  { %v364_v6 = vmul.f32 %v621_v1, %v363_v5 }
 0x1ad   :  { %v343_v7 = vpop.xlane.xlu0 %342  ;;  %v319_v8 = vpop.xlane.xlu2 %318 }
 0x1ae   :  { %v349_v9 = vmul.f32 0.0625, %v343_v7  ;;  %v325_v10 = vmul.f32 0.0625, %v319_v8  ;;  %v368_v11 = vsel %vm367_vm7, %v621_v1, %v364_v6  ;;  %v416_v8 = vld [vmem:[%s922_s3 + $0x8] sm:$0xff] }
 0x1af   :  { %v399_v12 = vmul.f32 %v368_v11, %v785_v14 }
 0x1b0   :  { %v329_v13 = vsel %vm241_vm3, %v325_v10, 0.0 }
 0x1b1   :  { %v353_v15 = vsel %vm752_vm2, %v349_v9, %v329_v13  ;;  %v403_v16 = vmul.f32 0.2, %v399_v12 }
 0x1b2   :  { %v357_v17 = vadd.f32 1e-05, %v353_v15 }
 0x1b3   :  { %v407_v19 = vmax.f32 %v399_v12, %v403_v16 }
 0x1b4   :  { %622 = vrsqrt.f32 %v357_v17  ;;  %vm385_vm9 = vweird.f32 %v357_v17 }
 0x1b5   :  { %v316_v21 = vpop.xlane.xlu2 %315  ;;  %v419_v22 = vmul.f32 %v415_v18, %v407_v19  ;;  %411 = vst.msk [vmem:[%s923_s5] sm:$0xff] %vm252_vm4, %v407_v19  ;;  %v418_v19 = vld [vmem:[%s922_s3 + $0x18] sm:$0xff] }
 0x1b6   :  { %v324_v14 = vmul.f32 0.0625, %v316_v21 }
 0x1b7   :  { %v457_v24 = vsel %vm752_vm2, %v419_v22, 0.0  ;;  %v423_v25 = vsel %vm241_vm3, %v419_v22, 0.0 }
 0x1b8   :  { %v328_v27 = vsel %vm241_vm3, %v324_v14, 0.0  ;;  %v461_v28 = vsel %vm252_vm4, %v457_v24, 0.0  ;;  %v427_v29 = vsel %vm252_vm4, %v423_v25, 0.0  ;;  %v12_v24 = vstv %s924_s4 }
 0x1b9   :  { %v352_v30 = vsel %vm752_vm2, %v348_v23, %v328_v27  ;;  %462 = vadd.xlane.f32.xlu2 %v461_v28  ;;  %428 = vadd.xlane.f32.xlu0 %v427_v29  ;;  %13 = vst [vmem:[#allocation2] sm:$0x1] %v12_v24 }
 0x1ba   :  { %v623_v31 = vpop.eup %622  ;;  %v356_v32 = vadd.f32 1e-05, %v352_v30 }
 0x1bb   :  { %v380_v33 = vmul.f32 %v623_v31, %v357_v17  ;;  %vm386_vm8 = vweird.f32 %v623_v31 }
 0x1bc   :  { %624 = vrsqrt.f32 %v356_v32  ;;  %vm387_vm10 = vmor %vm385_vm9, %vm386_vm8  ;;  %vm375_vm12 = vweird.f32 %v356_v32 }
 0x1bd   :  { %v381_v35 = vmul.f32 %v623_v31, %v380_v33  ;;  %v322_v36 = vpop.xlane.xlu1 %321  ;;  %v346_v38 = vpop.xlane.xlu2 %345 }
 0x1be   :  { %v326_v40 = vmul.f32 0.0625, %v322_v36  ;;  %v350_v41 = vmul.f32 0.0625, %v346_v38 }
 0x1bf   :  { %v382_v42 = vmul.f32 0.5, %v381_v35 }
 0x1c0   :  { %v330_v43 = vsel %vm241_vm3, %v326_v40, 0.0 }
 0x1c1   :  { %v383_v44 = vsub.f32 1.5, %v382_v42  ;;  %v354_v45 = vsel %vm752_vm2, %v350_v41, %v330_v43 }
 0x1c2   :  { %v625_v46 = vpop.eup %624  ;;  %v358_v47 = vadd.f32 1e-05, %v354_v45 }
 0x1c3   :  { %v370_v48 = vmul.f32 %v625_v46, %v356_v32  ;;  %v384_v49 = vmul.f32 %v623_v31, %v383_v44  ;;  %vm376_vm11 = vweird.f32 %v625_v46 }
 0x1c4   :  { %626 = vrsqrt.f32 %v358_v47  ;;  %vm377_vm13 = vmor %vm375_vm12, %vm376_vm11  ;;  %vm395_vm15 = vweird.f32 %v358_v47 }
 0x1c5   :  { %v371_v50 = vmul.f32 %v625_v46, %v370_v48  ;;  %v388_v51 = vsel %vm387_vm10, %v623_v31, %v384_v49 }
 0x1c6   :  { %v401_v53 = vmul.f32 %v388_v51, %v810_v37 }
 0x1c7   :  { %v372_v54 = vmul.f32 0.5, %v371_v50 }
 0x1c8   :  { %v405_v55 = vmul.f32 0.2, %v401_v53 }
 0x1c9   :  { %v373_v56 = vsub.f32 1.5, %v372_v54  ;;  %v448_v54 = vld [vmem:[#allocation2] sm:$0x1] }
 0x1ca   :  { %v627_v58 = vpop.eup %626  ;;  %v409_v59 = vmax.f32 %v401_v53, %v405_v55 }
 0x1cb   :  { %v390_v60 = vmul.f32 %v627_v58, %v358_v47  ;;  %v374_v61 = vmul.f32 %v625_v46, %v373_v56  ;;  %vm396_vm14 = vweird.f32 %v627_v58 }
 0x1cc   :  { %v421_v62 = vmul.f32 %v417_v57, %v409_v59  ;;  %413 = vst.msk [vmem:[%s923_s5 + $0x10] sm:$0xff] %vm252_vm4, %v409_v59  ;;  %vm397_vm0 = vmor %vm395_vm15, %vm396_vm14 }
 0x1cd   :  { %v391_v37 = vmul.f32 %v627_v58, %v390_v60  ;;  %v378_v63 = vsel %vm377_vm13, %v625_v46, %v374_v61 }
 0x1ce   :  { %v459_v0 = vsel %vm752_vm2, %v421_v62, 0.0  ;;  %v425_v1 = vsel %vm241_vm3, %v421_v62, 0.0  ;;  %v400_v2 = vmul.f32 %v378_v63, %v799_v26 }
 0x1cf   :  { %v392_v3 = vmul.f32 0.5, %v391_v37  ;;  %v467_v4 = vsel %vm252_vm4, %v459_v0, 0.0  ;;  %v433_v5 = vsel %vm252_vm4, %v425_v1, 0.0 }
 0x1d0   :  { %468 = vadd.xlane.f32.xlu2 %v467_v4  ;;  %434 = vadd.xlane.f32.xlu1 %v433_v5  ;;  %v404_v6 = vmul.f32 0.2, %v400_v2 }
 0x1d1   :  { %v393_v7 = vsub.f32 1.5, %v392_v3 }
 0x1d2   :  { %v408_v9 = vmax.f32 %v400_v2, %v404_v6 }
 0x1d3   :  { %v394_v10 = vmul.f32 %v627_v58, %v393_v7 }
 0x1d4   :  { %v420_v11 = vmul.f32 %v416_v8, %v408_v9  ;;  %412 = vst.msk [vmem:[%s923_s5 + $0x8] sm:$0xff] %vm252_vm4, %v408_v9 }
 0x1d5   :  { %v398_v26 = vsel %vm397_vm0, %v627_v58, %v394_v10 }
 0x1d6   :  { %v458_v12 = vsel %vm752_vm2, %v420_v11, 0.0  ;;  %v424_v13 = vsel %vm241_vm3, %v420_v11, 0.0  ;;  %v402_v15 = vmul.f32 %v398_v26, %v827_v52 }
 0x1d7   :  { %v464_v16 = vsel %vm252_vm4, %v458_v12, 0.0  ;;  %v430_v17 = vsel %vm252_vm4, %v424_v13, 0.0 }
 0x1d8   :  { %465 = vadd.xlane.f32.xlu0 %v464_v16  ;;  %431 = vadd.xlane.f32.xlu1 %v430_v17  ;;  %v406_v18 = vmul.f32 0.2, %v402_v15 }
 0x1da   :  { %v410_v20 = vmax.f32 %v402_v15, %v406_v18 }
 0x1dc   :  { %v422_v21 = vmul.f32 %v418_v19, %v410_v20  ;;  %414 = vst.msk [vmem:[%s923_s5 + $0x18] sm:$0xff] %vm252_vm4, %v410_v20 }
 0x1de   :  { %v460_v52 = vsel %vm752_vm2, %v422_v21, 0.0  ;;  %v426_v22 = vsel %vm241_vm3, %v422_v21, 0.0 }
 0x1df   :  { %v470_v14 = vsel %vm252_vm4, %v460_v52, 0.0  ;;  %v436_v23 = vsel %vm252_vm4, %v426_v22, 0.0 }
 0x1e0   :  { %471 = vadd.xlane.f32.xlu1 %v470_v14  ;;  %437 = vadd.xlane.f32.xlu0 %v436_v23 }
 0x22c   :  { %v429_v25 = vpop.xlane.xlu0 %428  ;;  %v463_v28 = vpop.xlane.xlu2 %462 }
 0x243   :  { %v435_v27 = vpop.xlane.xlu1 %434  ;;  %v469_v33 = vpop.xlane.xlu2 %468 }
 0x24b   :  { %v466_v29 = vpop.xlane.xlu0 %465  ;;  %v432_v30 = vpop.xlane.xlu1 %431 }
 0x24c   :  { %v473_v31 = vadd.f32 %v466_v29, %v463_v28  ;;  %v439_v32 = vadd.f32 %v432_v30, %v429_v25 }
 0x24e   :  { %v474_v35 = vadd.f32 %v473_v31, %v469_v33  ;;  %v440_v36 = vadd.f32 %v439_v32, %v435_v27 }
 0x253   :  { %v472_v38 = vpop.xlane.xlu1 %471  ;;  %v438_v40 = vpop.xlane.xlu0 %437 }
 0x254   :  { %v475_v41 = vadd.f32 %v474_v35, %v472_v38  ;;  %v441_v42 = vadd.f32 %v440_v36, %v438_v40 }
 0x256   :  { %v476_v43 = vrot.slane %v475_v41, 4  ;;  %v442_v44 = vrot.slane %v441_v42, 4 }
 0x258   :  { %v477_v45 = vadd.f32 %v476_v43, %v475_v41  ;;  %v443_v46 = vadd.f32 %v442_v44, %v441_v42 }
 0x25a   :  { %v478_v47 = vrot.slane %v477_v45, 2  ;;  %v444_v48 = vrot.slane %v443_v46, 2 }
 0x25c   :  { %v479_v49 = vadd.f32 %v478_v47, %v477_v45  ;;  %v445_v50 = vadd.f32 %v444_v48, %v443_v46 }
 0x25e   :  { %v480_v51 = vrot.slane %v479_v49, 1  ;;  %v446_v53 = vrot.slane %v445_v50, 1 }
 0x260   :  { %v447_v55 = vadd.f32 %v446_v53, %v445_v50  ;;  %v481_v56 = vadd.f32 %v480_v51, %v479_v49 }
 0x262   :  { %v449_v57 = vadd.f32 %v448_v54, %v447_v55  ;;  %v482_v58 = vadd.f32 %v481_v56, %v448_v54 }
 0x264   :  { %452 = vperm.xlu2 %619, %v449_v57   ;;  %485 = vperm.xlu0 %617, %v482_v58  }
 0x2be   :  { %v453_v59 = vpop.permute.xlu2 %452 }
 0x2bf   :  { %v455_v60 = vperm.slane %v453_v59, 0 }
 0x2c1   :  { %v456_v37 = vsel %vm241_vm3, %v455_v60, 0.0 }
 0x2d6   :  { %v486_v61 = vpop.permute.xlu0 %485 }
 0x2d7   :  { %v488_v62 = vperm.slane %v486_v61, 0 }
 0x2d9   :  { %v489_v63 = vsel %vm752_vm2, %v488_v62, %v456_v37 }
 0x2da   :  { %491 = vst.msk [vmem:[%s925_s6] sm:$0x1] %vm490_vm1, %v489_v63 }

</bundles_post_ra>
